<compile_context>
chip_gen: v7x
topology: tpu7x:2x2x1
jax: 0.10.0
libtpu: 0.0.40
codegen_flags: <defaults>
</compile_context>

<pallas_src>
import math
import jax
import jax.numpy as jnp
from jax.experimental import pallas as pl
from jax.experimental.pallas import tpu as pltpu


# ----------------------------------------------------------------------------
# Kernel 1: hoisted input-gate precompute.
#   g_gate = x @ W_ih[gate]^T + b_ih[gate], for all (t, b) rows at once, per direction.
# ----------------------------------------------------------------------------
def _gi_kernel(x_ref, wr_ref, wz_ref, wn_ref, br_ref, bz_ref, bn_ref,
               gr_ref, gz_ref, gn_ref):
    x = x_ref[...]                                     # (N, E) bf16
    gr_ref[0] = jnp.dot(x, wr_ref[0], preferred_element_type=jnp.float32) + br_ref[0]
    gz_ref[0] = jnp.dot(x, wz_ref[0], preferred_element_type=jnp.float32) + bz_ref[0]
    gn_ref[0] = jnp.dot(x, wn_ref[0], preferred_element_type=jnp.float32) + bn_ref[0]


def precompute_input_gates(x_flat, w_r, w_z, w_n, b_r, b_z, b_n):
    """x_flat: (N,E) bf16 (rows = time-major (t,b)). w_*: (n_dir,E,H) bf16, b_*: (n_dir,1,H) f32.
    Returns gr, gz, gn each (n_dir, N, H) f32."""
    N, E = x_flat.shape
    n_dir, _, H = w_r.shape
    out_sd = jax.ShapeDtypeStruct((n_dir, N, H), jnp.float32)
    w_spec = pl.BlockSpec((1, E, H), lambda d: (d, 0, 0))
    b_spec = pl.BlockSpec((1, 1, H), lambda d: (d, 0, 0))
    o_spec = pl.BlockSpec((1, N, H), lambda d: (d, 0, 0))
    # TODO(synk): for very large N (= T*B) tile the row axis as well.
    return pl.pallas_call(
        _gi_kernel,
        out_shape=(out_sd, out_sd, out_sd),
        grid=(n_dir,),
        in_specs=[pl.BlockSpec((N, E), lambda d: (0, 0)),
                  w_spec, w_spec, w_spec, b_spec, b_spec, b_spec],
        out_specs=(o_spec, o_spec, o_spec),
        compiler_params=pltpu.CompilerParams(dimension_semantics=("parallel",)),
    )(x_flat, w_r, w_z, w_n, b_r, b_z, b_n)


# ----------------------------------------------------------------------------
# Kernel 2: masked GRU scan over time, fused over directions.
#   grid = (n_dir, T); direction axis "parallel" (megacore on v7x), time "arbitrary".
#   Backward direction handled by flipping the time index in the index_maps.
# ----------------------------------------------------------------------------
def _gru_kernel(gr_ref, gz_ref, gn_ref, len_ref, h0_ref,
                wr_ref, wz_ref, wn_ref, br_ref, bz_ref, bn_ref,
                out_ref, hfin_ref, h_scr):
    d = pl.program_id(0)
    t = pl.program_id(1)
    T = pl.num_programs(1)
    # original time index handled at this grid step (backward dir runs time reversed)
    time_in = (1 - d) * t + d * (T - 1 - t)

    @pl.when(t == 0)
    def _():
        h_scr[...] = h0_ref[0]

    h = h_scr[...]                                     # (B, H) f32
    hb = h.astype(jnp.bfloat16)
    gh_r = jnp.dot(hb, wr_ref[0], preferred_element_type=jnp.float32) + br_ref[0]
    gh_z = jnp.dot(hb, wz_ref[0], preferred_element_type=jnp.float32) + bz_ref[0]
    gh_n = jnp.dot(hb, wn_ref[0], preferred_element_type=jnp.float32) + bn_ref[0]

    r = jax.nn.sigmoid(gr_ref[0, 0] + gh_r)            # elementwise kept in f32 (v5e VPU)
    z = jax.nn.sigmoid(gz_ref[0, 0] + gh_z)
    n = jnp.tanh(gn_ref[0, 0] + r * gh_n)
    h_new = (1.0 - z) * n + z * h

    valid = time_in < len_ref[...]                     # (B, 1) bool; pack_padded emulation
    h_upd = jnp.where(valid, h_new, h)
    h_scr[...] = h_upd
    out_ref[0, 0] = jnp.where(valid, h_upd, 0.0).astype(out_ref.dtype)  # padded outputs -> 0

    @pl.when(t == T - 1)                               # single final-hidden store
    def _():
        hfin_ref[0] = h_upd


def gru_scan(gi_r, gi_z, gi_n, lengths, h0,
             whh_r, whh_z, whh_n, bhh_r, bhh_z, bhh_n):
    """gi_*: (n_dir,T,B,H) f32 (precomputed input gates, original time order).
    lengths: (B,1) int32. h0: (n_dir,B,H) f32. whh_*: (n_dir,H,H) bf16. bhh_*: (n_dir,1,H) f32.
    Returns out (n_dir,T,B,H) bf16 (padded steps zeroed, backward already un-reversed),
            hfin (n_dir,B,H) f32."""
    n_dir, T, B, H = gi_r.shape

    def flip_map(d, t):
        return (d, (1 - d) * t + d * (T - 1 - t), 0, 0)

    gi_spec = pl.BlockSpec((1, 1, B, H), flip_map)
    w_spec = pl.BlockSpec((1, H, H), lambda d, t: (d, 0, 0))
    b_spec = pl.BlockSpec((1, 1, H), lambda d, t: (d, 0, 0))
    # TODO(synk): for long T, move the time loop inside one kernel invocation
    # (emit_pipeline over gi blocks) to amortize per-grid-step overhead.
    out, hfin = pl.pallas_call(
        _gru_kernel,
        out_shape=(jax.ShapeDtypeStruct((n_dir, T, B, H), jnp.bfloat16),
                   jax.ShapeDtypeStruct((n_dir, B, H), jnp.float32)),
        grid=(n_dir, T),
        in_specs=[gi_spec, gi_spec, gi_spec,
                  pl.BlockSpec((B, 1), lambda d, t: (0, 0)),
                  pl.BlockSpec((1, B, H), lambda d, t: (d, 0, 0)),
                  w_spec, w_spec, w_spec, b_spec, b_spec, b_spec],
        out_specs=(pl.BlockSpec((1, 1, B, H), flip_map),
                   pl.BlockSpec((1, B, H), lambda d, t: (d, 0, 0))),
        scratch_shapes=[pltpu.VMEM((B, H), jnp.float32)],
        compiler_params=pltpu.CompilerParams(
            dimension_semantics=("parallel", "arbitrary")),
    )(gi_r, gi_z, gi_n, lengths, h0,
      whh_r, whh_z, whh_n, bhh_r, bhh_z, bhh_n)
    return out, hfin


# ----------------------------------------------------------------------------
# Kernel 3: encoder bridge  hid = tanh(W_f h_fwd + W_b h_bwd + b)  (concat via split matmuls)
# ----------------------------------------------------------------------------
def _bridge_kernel(hf_ref, hb_ref, wf_ref, wb_ref, b_ref, o_ref):
    o_ref[...] = jnp.tanh(
        jnp.dot(hf_ref[...], wf_ref[...], preferred_element_type=jnp.float32)
        + jnp.dot(hb_ref[...], wb_ref[...], preferred_element_type=jnp.float32)
        + b_ref[...])


def bridge(h_f, h_b, fc_w, fc_b):
    B, He = h_f.shape
    Hd = fc_w.shape[0]
    return pl.pallas_call(
        _bridge_kernel,
        out_shape=jax.ShapeDtypeStruct((B, Hd), jnp.float32),
    )(h_f.astype(jnp.bfloat16), h_b.astype(jnp.bfloat16),
      fc_w[:, :He].T.astype(jnp.bfloat16), fc_w[:, He:].T.astype(jnp.bfloat16),
      fc_b.reshape(1, Hd).astype(jnp.float32))


# ----------------------------------------------------------------------------
# Kernel 4: attention (mask built in-kernel from lengths) + tanh(linear_out(cat)).
# ----------------------------------------------------------------------------
def _attn_kernel(dec_ref, ctx_ref, xlen_ref, ylen_ref,
                 win_ref, woc_ref, wod_ref, bout_ref,
                 h_ref, attn_ref):
    dec = dec_ref[...]                                 # (B, Ty, D) bf16
    ctx = ctx_ref[...]                                 # (B, Tx, C) bf16, C = 2*enc_hidden
    B, Ty, D = dec.shape
    _, Tx, C = ctx.shape

    # ctx_in = ctx @ W_in^T                            (linear_in, no bias)
    ctx_in = jnp.dot(ctx.reshape(B * Tx, C), win_ref[...],
                     preferred_element_type=jnp.float32).reshape(B, Tx, D)

    # scores = dec @ ctx_in^T (batched, bf16 operands, f32 accumulate)
    scores = jnp.einsum('btd,bsd->bts', dec, ctx_in.astype(jnp.bfloat16),
                        preferred_element_type=jnp.float32)

    # mask built in-kernel: invalid where query or key position is padding
    ty_idx = jax.lax.broadcasted_iota(jnp.int32, (B, Ty, Tx), 1)
    tx_idx = jax.lax.broadcasted_iota(jnp.int32, (B, Ty, Tx), 2)
    valid = (ty_idx < ylen_ref[...][:, :, None]) & (tx_idx < xlen_ref[...][:, :, None])
    scores = jnp.where(valid, scores, -1e6)            # masked_fill(mask, -1e6)

    # softmax over ctx axis (exact divide so rows sum to 1 exactly)
    scores = scores - jnp.max(scores, axis=-1, keepdims=True)
    e = jnp.exp(scores)
    attn = e / jnp.sum(e, axis=-1, keepdims=True)
    attn_ref[...] = attn

    # context = attn @ ctx (batched)
    context = jnp.einsum('bts,bsc->btc', attn.astype(jnp.bfloat16), ctx,
                         preferred_element_type=jnp.float32)

    # tanh(linear_out(cat(context, dec)))  -- concat realized as split matmuls
    h_ref[...] = jnp.tanh(
        jnp.dot(context.reshape(B * Ty, C).astype(jnp.bfloat16), woc_ref[...],
                preferred_element_type=jnp.float32)
        + jnp.dot(dec.reshape(B * Ty, D), wod_ref[...],
                  preferred_element_type=jnp.float32)
        + bout_ref[...])


def attention(dec_out, ctx, x_lengths, y_lengths, w_in, w_out, b_out):
    B, Ty, D = dec_out.shape
    _, Tx, C = ctx.shape
    return pl.pallas_call(
        _attn_kernel,
        out_shape=(jax.ShapeDtypeStruct((B * Ty, D), jnp.float32),
                   jax.ShapeDtypeStruct((B, Ty, Tx), jnp.float32)),
        compiler_params=pltpu.CompilerParams(vmem_limit_bytes=32 * 1024 * 1024),
    )(dec_out.astype(jnp.bfloat16), ctx.astype(jnp.bfloat16),
      x_lengths.reshape(B, 1).astype(jnp.int32),
      y_lengths.reshape(B, 1).astype(jnp.int32),
      w_in.T.astype(jnp.bfloat16),                 # (C, D)
      w_out[:, :C].T.astype(jnp.bfloat16),         # (C, D)  context part of cat
      w_out[:, C:].T.astype(jnp.bfloat16),         # (D, D)  decoder-output part of cat
      b_out.reshape(1, D).astype(jnp.float32))


# ----------------------------------------------------------------------------
# Kernel 5: tiled vocab projection + log_softmax (online logsumexp across vocab tiles).
# ----------------------------------------------------------------------------
def _vocab_head_kernel(h_ref, wv_ref, bv_ref, logits_ref, lse_ref, m_scr, s_scr):
    j = pl.program_id(0)

    @pl.when(j == 0)
    def _():
        m_scr[...] = jnp.full(m_scr.shape, -jnp.inf, dtype=jnp.float32)
        s_scr[...] = jnp.zeros(s_scr.shape, dtype=jnp.float32)

    logits = jnp.dot(h_ref[...], wv_ref[...],
                     preferred_element_type=jnp.float32) + bv_ref[...]
    logits_ref[...] = logits

    m_prev = m_scr[...]
    m_new = jnp.maximum(m_prev, jnp.max(logits, axis=-1, keepdims=True))
    s_scr[...] = (s_scr[...] * jnp.exp(m_prev - m_new)
                  + jnp.sum(jnp.exp(logits - m_new), axis=-1, keepdims=True))
    m_scr[...] = m_new

    @pl.when(j == pl.num_programs(0) - 1)
    def _():
        lse_ref[...] = m_scr[...] + jnp.log(s_scr[...])


def _sub_lse_kernel(logits_ref, lse_ref, o_ref):
    o_ref[...] = logits_ref[...] - lse_ref[...]


def _vocab_tile(V):
    for tv in (2048, 1024, 512, 256, 128):
        if V % tv == 0:
            return tv
    return V


def log_softmax_head(h, w_v, b_v):
    """h: (N, D) f32. w_v: (V, D). b_v: (V,). Returns log-probs (N, V) f32."""
    N, D = h.shape
    V = w_v.shape[0]
    tv = _vocab_tile(V)
    nj = V // tv
    hb = h.astype(jnp.bfloat16)
    wv_t = w_v.T.astype(jnp.bfloat16)
    bv = b_v.reshape(1, V).astype(jnp.float32)

    logits, lse = pl.pallas_call(
        _vocab_head_kernel,
        out_shape=(jax.ShapeDtypeStruct((N, V), jnp.float32),
                   jax.ShapeDtypeStruct((N, 1), jnp.float32)),
        grid=(nj,),
        in_specs=[pl.BlockSpec((N, D), lambda j: (0, 0)),
                  pl.BlockSpec((D, tv), lambda j: (0, j)),
                  pl.BlockSpec((1, tv), lambda j: (0, j))],
        out_specs=(pl.BlockSpec((N, tv), lambda j: (0, j)),
                   pl.BlockSpec((N, 1), lambda j: (0, 0))),
        scratch_shapes=[pltpu.VMEM((N, 1), jnp.float32),
                        pltpu.VMEM((N, 1), jnp.float32)],
        compiler_params=pltpu.CompilerParams(
            dimension_semantics=("arbitrary",),
            vmem_limit_bytes=32 * 1024 * 1024),
    )(hb, wv_t, bv)

    logp = pl.pallas_call(
        _sub_lse_kernel,
        out_shape=jax.ShapeDtypeStruct((N, V), jnp.float32),
        grid=(nj,),
        in_specs=[pl.BlockSpec((N, tv), lambda j: (0, j)),
                  pl.BlockSpec((N, 1), lambda j: (0, 0))],
        out_specs=pl.BlockSpec((N, tv), lambda j: (0, j)),
        compiler_params=pltpu.CompilerParams(
            dimension_semantics=("parallel",),
            vmem_limit_bytes=32 * 1024 * 1024),
    )(logits, lse)
    return logp


# ----------------------------------------------------------------------------
# Parameter preprocessing: PyTorch-style weights -> per-gate, per-direction,
# transposed, bf16 matmul operands (f32 biases).
# ----------------------------------------------------------------------------
def _split_gates(w, b, H):
    """GRU weight (3H, in) / bias (3H,) -> per-gate transposed (in,H) bf16 and (1,H) f32,
    gate order (r, z, n) as in PyTorch."""
    ws = tuple(w[g * H:(g + 1) * H, :].T.astype(jnp.bfloat16) for g in range(3))
    bs = tuple(b[g * H:(g + 1) * H].reshape(1, H).astype(jnp.float32) for g in range(3))
    return ws, bs


def prep_params(p):
    q = dict(p)
    He = p['enc_f_whh'].shape[1]
    Hd = p['dec_whh'].shape[1]

    ef_iw, ef_ib = _split_gates(p['enc_f_wih'], p['enc_f_bih'], He)
    eb_iw, eb_ib = _split_gates(p['enc_b_wih'], p['enc_b_bih'], He)
    ef_hw, ef_hb = _split_gates(p['enc_f_whh'], p['enc_f_bhh'], He)
    eb_hw, eb_hb = _split_gates(p['enc_b_whh'], p['enc_b_bhh'], He)
    d_iw, d_ib = _split_gates(p['dec_wih'], p['dec_bih'], Hd)
    d_hw, d_hb = _split_gates(p['dec_whh'], p['dec_bhh'], Hd)

    for i, g in enumerate('rzn'):
        q[f'enc_wih_{g}'] = jnp.stack([ef_iw[i], eb_iw[i]])   # (2, E, He) bf16
        q[f'enc_bih_{g}'] = jnp.stack([ef_ib[i], eb_ib[i]])   # (2, 1, He) f32
        q[f'enc_whh_{g}'] = jnp.stack([ef_hw[i], eb_hw[i]])   # (2, He, He) bf16
        q[f'enc_bhh_{g}'] = jnp.stack([ef_hb[i], eb_hb[i]])   # (2, 1, He) f32
        q[f'dec_wih_{g}'] = d_iw[i][None]                     # (1, E, Hd) bf16
        q[f'dec_bih_{g}'] = d_ib[i][None]
        q[f'dec_whh_{g}'] = d_hw[i][None]
        q[f'dec_bhh_{g}'] = d_hb[i][None]
    return q


# ----------------------------------------------------------------------------
# Glue: encoder / decoder / Seq2Seq.forward
# ----------------------------------------------------------------------------
def encoder_forward(q, x, x_lengths):
    B, Tx = x.shape
    He = q['enc_whh_r'].shape[-1]
    E = q['emb_src'].shape[1]

    # Gather embeddings directly in TIME-MAJOR by transposing the (tiny) id matrix
    # instead of the embedded tensor -> no (B,T,E) transpose copy.  (dropout = identity)
    emb_tm = q['emb_src'][x.T].astype(jnp.bfloat16)            # (Tx, B, E)
    x_flat = emb_tm.reshape(Tx * B, E)

    gr, gz, gn = precompute_input_gates(
        x_flat,
        q['enc_wih_r'], q['enc_wih_z'], q['enc_wih_n'],
        q['enc_bih_r'], q['enc_bih_z'], q['enc_bih_n'])
    gr = gr.reshape(2, Tx, B, He)
    gz = gz.reshape(2, Tx, B, He)
    gn = gn.reshape(2, Tx, B, He)

    lengths = x_lengths.reshape(B, 1).astype(jnp.int32)
    h0 = jnp.zeros((2, B, He), jnp.float32)
    out, hfin = gru_scan(gr, gz, gn, lengths, h0,
                         q['enc_whh_r'], q['enc_whh_z'], q['enc_whh_n'],
                         q['enc_bhh_r'], q['enc_bhh_z'], q['enc_bhh_n'])

    # out: (2, Tx, B, He); dir 0 = forward, dir 1 = backward (already un-reversed by the
    # index_map time flip).  One bf16 concat + transpose to batch-major for attention.
    enc_out = jnp.transpose(jnp.concatenate([out[0], out[1]], axis=-1), (1, 0, 2))
    hid = bridge(hfin[0], hfin[1], q['fc_w'], q['fc_b'])        # (B, Hd)
    return enc_out, hid


def decoder_forward(q, ctx, ctx_lengths, y, y_lengths, hid):
    B, Ty = y.shape
    Hd = q['dec_whh_r'].shape[-1]
    E = q['emb_tgt'].shape[1]

    emb_tm = q['emb_tgt'][y.T].astype(jnp.bfloat16)            # (Ty, B, E)
    y_flat = emb_tm.reshape(Ty * B, E)
    gr, gz, gn = precompute_input_gates(
        y_flat,
        q['dec_wih_r'], q['dec_wih_z'], q['dec_wih_n'],
        q['dec_bih_r'], q['dec_bih_z'], q['dec_bih_n'])
    gr = gr.reshape(1, Ty, B, Hd)
    gz = gz.reshape(1, Ty, B, Hd)
    gn = gn.reshape(1, Ty, B, Hd)

    lengths = y_lengths.reshape(B, 1).astype(jnp.int32)
    out, hfin = gru_scan(gr, gz, gn, lengths, hid[None],
                         q['dec_whh_r'], q['dec_whh_z'], q['dec_whh_n'],
                         q['dec_bhh_r'], q['dec_bhh_z'], q['dec_bhh_n'])
    dec_out = jnp.transpose(out[0], (1, 0, 2))                  # (B, Ty, Hd) bf16

    h_flat, attn = attention(dec_out, ctx, ctx_lengths, y_lengths,
                             q['attn_w_in'], q['attn_w_out'], q['attn_b_out'])
    V = q['out_w'].shape[0]
    logp = log_softmax_head(h_flat, q['out_w'], q['out_b']).reshape(B, Ty, V)
    return logp, hfin[0], attn


def seq2seq_forward(p, x, x_lengths, y, y_lengths):
    q = prep_params(p)
    encoder_out, hid = encoder_forward(q, x, x_lengths)
    output, hid, attn = decoder_forward(q, encoder_out, x_lengths, y, y_lengths, hid)
    return output, attn


# ----------------------------------------------------------------------------
# Deterministic parameter construction (PyTorch-style layouts)
# ----------------------------------------------------------------------------
def make_params(key, V_src, V_tgt, E, He, Hd):
    keys = jax.random.split(key, 32)
    k = iter(keys)

    def u(shape, fan):
        s = 1.0 / math.sqrt(fan)
        return jax.random.uniform(next(k), shape, jnp.float32, -s, s)

    C = 2 * He
    p = {
        'emb_src': jax.random.normal(next(k), (V_src, E), jnp.float32) * 0.1,
        'emb_tgt': jax.random.normal(next(k), (V_tgt, E), jnp.float32) * 0.1,
        # encoder bi-GRU
        'enc_f_wih': u((3 * He, E), He), 'enc_f_whh': u((3 * He, He), He),
        'enc_f_bih': u((3 * He,), He),   'enc_f_bhh': u((3 * He,), He),
        'enc_b_wih': u((3 * He, E), He), 'enc_b_whh': u((3 * He, He), He),
        'enc_b_bih': u((3 * He,), He),   'enc_b_bhh': u((3 * He,), He),
        # encoder bridge fc: 2*He -> Hd
        'fc_w': u((Hd, C), C), 'fc_b': u((Hd,), C),
        # decoder GRU
        'dec_wih': u((3 * Hd, E), Hd), 'dec_whh': u((3 * Hd, Hd), Hd),
        'dec_bih': u((3 * Hd,), Hd),   'dec_bhh': u((3 * Hd,), Hd),
        # attention: linear_in (no bias), linear_out
        'attn_w_in': u((Hd, C), C),
        'attn_w_out': u((Hd, C + Hd), C + Hd), 'attn_b_out': u((Hd,), C + Hd),
        # output projection to vocab
        'out_w': u((V_tgt, Hd), Hd), 'out_b': u((V_tgt,), Hd),
    }
    return p


# TODO(synk): `translate()` (greedy decode loop) is host-side control flow; only the
# hot forward path is implemented as kernels here.
# NOTE: production shapes should pad B to a multiple of 8 (16 for bf16) and E/H to
# multiples of 128 (256 for the gate dims on v6e/v7x) for full MXU/vreg utilization.

if __name__ == "__main__":
    B, Tx, Ty = 2, 8, 6
    V_src, V_tgt = 16, 16
    E, He, Hd = 8, 16, 16

    root = jax.random.PRNGKey(0)
    kp, kx, ky = jax.random.split(root, 3)
    params = make_params(kp, V_src, V_tgt, E, He, Hd)

    x = jax.random.randint(kx, (B, Tx), 0, V_src, dtype=jnp.int32)
    y = jax.random.randint(ky, (B, Ty), 0, V_tgt, dtype=jnp.int32)
    x_lengths = jnp.array([8, 5], dtype=jnp.int32)   # sorted desc (pack_padded convention)
    y_lengths = jnp.array([6, 4], dtype=jnp.int32)

    fwd = jax.jit(seq2seq_forward)
    output, attn = fwd(params, x, x_lengths, y, y_lengths)
    jax.block_until_ready((output, attn))

    assert output.shape == (B, Ty, V_tgt)
    assert attn.shape == (B, Ty, Tx)
    assert bool(jnp.all(jnp.isfinite(output))) and bool(jnp.all(jnp.isfinite(attn)))
    # attention rows must sum to 1 (exact divide kept in the softmax for this check)
    assert bool(jnp.allclose(attn.sum(-1), 1.0, atol=1e-4))
    print("KERNEL_OK")
</pallas_src>

<mosaic_0001>
module attributes {stable_mosaic.version = 11 : i64} {
  func.func @_gi_kernel(%arg0: i32, %arg1: memref<16x8xbf16, #tpu.memory_space<vmem>>, %arg2: memref<1x8x16xbf16, #tpu.memory_space<vmem>>, %arg3: memref<1x8x16xbf16, #tpu.memory_space<vmem>>, %arg4: memref<1x8x16xbf16, #tpu.memory_space<vmem>>, %arg5: memref<1x1x16xf32, #tpu.memory_space<vmem>>, %arg6: memref<1x1x16xf32, #tpu.memory_space<vmem>>, %arg7: memref<1x1x16xf32, #tpu.memory_space<vmem>>, %arg8: memref<1x16x16xf32, #tpu.memory_space<vmem>>, %arg9: memref<1x16x16xf32, #tpu.memory_space<vmem>>, %arg10: memref<1x16x16xf32, #tpu.memory_space<vmem>>) attributes {dimension_semantics = [#tpu.dimension_semantics<parallel>], iteration_bounds = array<i64: 2>, scalar_prefetch = 0 : i64, scratch_operands = 0 : i64, tpu.core_type = #tpu.core_type<tc>, window_params = [{pipeline_mode = #tpu.pipeline_mode<synchronous>, transform_indices = @transform_0, window_bounds = array<i64: 16, 8>}, {transform_indices = @transform_1, window_bounds = array<i64: 1, 8, 16>}, {transform_indices = @transform_2, window_bounds = array<i64: 1, 8, 16>}, {transform_indices = @transform_3, window_bounds = array<i64: 1, 8, 16>}, {transform_indices = @transform_4, window_bounds = array<i64: 1, 1, 16>}, {transform_indices = @transform_5, window_bounds = array<i64: 1, 1, 16>}, {transform_indices = @transform_6, window_bounds = array<i64: 1, 1, 16>}, {transform_indices = @transform_7, window_bounds = array<i64: 1, 16, 16>}, {transform_indices = @transform_8, window_bounds = array<i64: 1, 16, 16>}, {transform_indices = @transform_9, window_bounds = array<i64: 1, 16, 16>}]} {
    %c0 = arith.constant 0 : index
    %c0_0 = arith.constant 0 : index
    %0 = vector.load %arg1[%c0, %c0_0] : memref<16x8xbf16, #tpu.memory_space<vmem>>, vector<16x8xbf16>
    %c0_1 = arith.constant 0 : index
    %c0_2 = arith.constant 0 : index
    %c0_3 = arith.constant 0 : index
    %1 = vector.load %arg2[%c0_1, %c0_2, %c0_3] : memref<1x8x16xbf16, #tpu.memory_space<vmem>>, vector<1x8x16xbf16>
    %2 = vector.shape_cast %1 : vector<1x8x16xbf16> to vector<8x16xbf16>
    %cst = arith.constant dense<0.000000e+00> : vector<16x16xf32>
    %3 = tpu.matmul %0, %2, %cst {dimension_numbers = #tpu.dot_dimension_numbers<[1], [0], [0], [1], [0, 0, 1, 1], [], []>} : vector<16x8xbf16>, vector<8x16xbf16>, vector<16x16xf32> -> vector<16x16xf32>
    %c0_4 = arith.constant 0 : index
    %c0_5 = arith.constant 0 : index
    %c0_6 = arith.constant 0 : index
    %4 = vector.load %arg5[%c0_4, %c0_5, %c0_6] : memref<1x1x16xf32, #tpu.memory_space<vmem>>, vector<1x1x16xf32>
    %5 = vector.shape_cast %4 : vector<1x1x16xf32> to vector<1x16xf32>
    %6 = vector.broadcast %5 : vector<1x16xf32> to vector<16x16xf32>
    %7 = arith.addf %3, %6 : vector<16x16xf32>
    %c0_7 = arith.constant 0 : index
    %c0_8 = arith.constant 0 : index
    %c0_9 = arith.constant 0 : index
    %8 = vector.load %arg8[%c0_7, %c0_8, %c0_9] : memref<1x16x16xf32, #tpu.memory_space<vmem>>, vector<1x16x16xf32>
    %9 = vector.shape_cast %8 : vector<1x16x16xf32> to vector<16x16xf32>
    %10 = vector.shape_cast %7 : vector<16x16xf32> to vector<1x16x16xf32>
    tpu.vector_store %arg8[%c0_7, %c0_8, %c0_9], %10 {strides = array<i32>} : memref<1x16x16xf32, #tpu.memory_space<vmem>>, vector<1x16x16xf32>,
    %c0_10 = arith.constant 0 : index
    %c0_11 = arith.constant 0 : index
    %c0_12 = arith.constant 0 : index
    %11 = vector.load %arg3[%c0_10, %c0_11, %c0_12] : memref<1x8x16xbf16, #tpu.memory_space<vmem>>, vector<1x8x16xbf16>
    %12 = vector.shape_cast %11 : vector<1x8x16xbf16> to vector<8x16xbf16>
    %cst_13 = arith.constant dense<0.000000e+00> : vector<16x16xf32>
    %13 = tpu.matmul %0, %12, %cst_13 {dimension_numbers = #tpu.dot_dimension_numbers<[1], [0], [0], [1], [0, 0, 1, 1], [], []>} : vector<16x8xbf16>, vector<8x16xbf16>, vector<16x16xf32> -> vector<16x16xf32>
    %c0_14 = arith.constant 0 : index
    %c0_15 = arith.constant 0 : index
    %c0_16 = arith.constant 0 : index
    %14 = vector.load %arg6[%c0_14, %c0_15, %c0_16] : memref<1x1x16xf32, #tpu.memory_space<vmem>>, vector<1x1x16xf32>
    %15 = vector.shape_cast %14 : vector<1x1x16xf32> to vector<1x16xf32>
    %16 = vector.broadcast %15 : vector<1x16xf32> to vector<16x16xf32>
    %17 = arith.addf %13, %16 : vector<16x16xf32>
    %c0_17 = arith.constant 0 : index
    %c0_18 = arith.constant 0 : index
    %c0_19 = arith.constant 0 : index
    %18 = vector.load %arg9[%c0_17, %c0_18, %c0_19] : memref<1x16x16xf32, #tpu.memory_space<vmem>>, vector<1x16x16xf32>
    %19 = vector.shape_cast %18 : vector<1x16x16xf32> to vector<16x16xf32>
    %20 = vector.shape_cast %17 : vector<16x16xf32> to vector<1x16x16xf32>
    tpu.vector_store %arg9[%c0_17, %c0_18, %c0_19], %20 {strides = array<i32>} : memref<1x16x16xf32, #tpu.memory_space<vmem>>, vector<1x16x16xf32>,
    %c0_20 = arith.constant 0 : index
    %c0_21 = arith.constant 0 : index
    %c0_22 = arith.constant 0 : index
    %21 = vector.load %arg4[%c0_20, %c0_21, %c0_22] : memref<1x8x16xbf16, #tpu.memory_space<vmem>>, vector<1x8x16xbf16>
    %22 = vector.shape_cast %21 : vector<1x8x16xbf16> to vector<8x16xbf16>
    %cst_23 = arith.constant dense<0.000000e+00> : vector<16x16xf32>
    %23 = tpu.matmul %0, %22, %cst_23 {dimension_numbers = #tpu.dot_dimension_numbers<[1], [0], [0], [1], [0, 0, 1, 1], [], []>} : vector<16x8xbf16>, vector<8x16xbf16>, vector<16x16xf32> -> vector<16x16xf32>
    %c0_24 = arith.constant 0 : index
    %c0_25 = arith.constant 0 : index
    %c0_26 = arith.constant 0 : index
    %24 = vector.load %arg7[%c0_24, %c0_25, %c0_26] : memref<1x1x16xf32, #tpu.memory_space<vmem>>, vector<1x1x16xf32>
    %25 = vector.shape_cast %24 : vector<1x1x16xf32> to vector<1x16xf32>
    %26 = vector.broadcast %25 : vector<1x16xf32> to vector<16x16xf32>
    %27 = arith.addf %23, %26 : vector<16x16xf32>
    %c0_27 = arith.constant 0 : index
    %c0_28 = arith.constant 0 : index
    %c0_29 = arith.constant 0 : index
    %28 = vector.load %arg10[%c0_27, %c0_28, %c0_29] : memref<1x16x16xf32, #tpu.memory_space<vmem>>, vector<1x16x16xf32>
    %29 = vector.shape_cast %28 : vector<1x16x16xf32> to vector<16x16xf32>
    %30 = vector.shape_cast %27 : vector<16x16xf32> to vector<1x16x16xf32>
    tpu.vector_store %arg10[%c0_27, %c0_28, %c0_29], %30 {strides = array<i32>} : memref<1x16x16xf32, #tpu.memory_space<vmem>>, vector<1x16x16xf32>,
    return
  }
  func.func @transform_0(%arg0: i32) -> (i32, i32) {
    %c0_i32 = arith.constant 0 : i32
    %c0_i32_0 = arith.constant 0 : i32
    %c0_i32_1 = arith.constant 0 : i32
    return %c0_i32, %c0_i32_0 : i32, i32
  }
  func.func @transform_1(%arg0: i32) -> (i32, i32, i32) {
    %c0_i32 = arith.constant 0 : i32
    %c0_i32_0 = arith.constant 0 : i32
    %c0_i32_1 = arith.constant 0 : i32
    return %arg0, %c0_i32, %c0_i32_0 : i32, i32, i32
  }
  func.func @transform_2(%arg0: i32) -> (i32, i32, i32) {
    %c0_i32 = arith.constant 0 : i32
    %c0_i32_0 = arith.constant 0 : i32
    %c0_i32_1 = arith.constant 0 : i32
    return %arg0, %c0_i32, %c0_i32_0 : i32, i32, i32
  }
  func.func @transform_3(%arg0: i32) -> (i32, i32, i32) {
    %c0_i32 = arith.constant 0 : i32
    %c0_i32_0 = arith.constant 0 : i32
    %c0_i32_1 = arith.constant 0 : i32
    return %arg0, %c0_i32, %c0_i32_0 : i32, i32, i32
  }
  func.func @transform_4(%arg0: i32) -> (i32, i32, i32) {
    %c0_i32 = arith.constant 0 : i32
    %c0_i32_0 = arith.constant 0 : i32
    %c0_i32_1 = arith.constant 0 : i32
    return %arg0, %c0_i32, %c0_i32_0 : i32, i32, i32
  }
  func.func @transform_5(%arg0: i32) -> (i32, i32, i32) {
    %c0_i32 = arith.constant 0 : i32
    %c0_i32_0 = arith.constant 0 : i32
    %c0_i32_1 = arith.constant 0 : i32
    return %arg0, %c0_i32, %c0_i32_0 : i32, i32, i32
  }
  func.func @transform_6(%arg0: i32) -> (i32, i32, i32) {
    %c0_i32 = arith.constant 0 : i32
    %c0_i32_0 = arith.constant 0 : i32
    %c0_i32_1 = arith.constant 0 : i32
    return %arg0, %c0_i32, %c0_i32_0 : i32, i32, i32
  }
  func.func @transform_7(%arg0: i32) -> (i32, i32, i32) {
    %c0_i32 = arith.constant 0 : i32
    %c0_i32_0 = arith.constant 0 : i32
    %c0_i32_1 = arith.constant 0 : i32
    return %arg0, %c0_i32, %c0_i32_0 : i32, i32, i32
  }
  func.func @transform_8(%arg0: i32) -> (i32, i32, i32) {
    %c0_i32 = arith.constant 0 : i32
    %c0_i32_0 = arith.constant 0 : i32
    %c0_i32_1 = arith.constant 0 : i32
    return %arg0, %c0_i32, %c0_i32_0 : i32, i32, i32
  }
  func.func @transform_9(%arg0: i32) -> (i32, i32, i32) {
    %c0_i32 = arith.constant 0 : i32
    %c0_i32_0 = arith.constant 0 : i32
    %c0_i32_1 = arith.constant 0 : i32
    return %arg0, %c0_i32, %c0_i32_0 : i32, i32, i32
  }
}

module attributes {stable_mosaic.version = 11 : i64} {
  func.func @_gru_kernel(%arg0: i32, %arg1: i32, %arg2: memref<1x1x2x16xf32, #tpu.memory_space<vmem>>, %arg3: memref<1x1x2x16xf32, #tpu.memory_space<vmem>>, %arg4: memref<1x1x2x16xf32, #tpu.memory_space<vmem>>, %arg5: memref<2x1xi32, #tpu.memory_space<vmem>>, %arg6: memref<1x2x16xf32, #tpu.memory_space<vmem>>, %arg7: memref<1x16x16xbf16, #tpu.memory_space<vmem>>, %arg8: memref<1x16x16xbf16, #tpu.memory_space<vmem>>, %arg9: memref<1x16x16xbf16, #tpu.memory_space<vmem>>, %arg10: memref<1x1x16xf32, #tpu.memory_space<vmem>>, %arg11: memref<1x1x16xf32, #tpu.memory_space<vmem>>, %arg12: memref<1x1x16xf32, #tpu.memory_space<vmem>>, %arg13: memref<1x1x2x16xbf16, #tpu.memory_space<vmem>>, %arg14: memref<1x2x16xf32, #tpu.memory_space<vmem>>, %arg15: memref<2x16xf32, #tpu.memory_space<vmem>>) attributes {dimension_semantics = [#tpu.dimension_semantics<parallel>, #tpu.dimension_semantics<arbitrary>], iteration_bounds = array<i64: 2, 8>, scalar_prefetch = 0 : i64, scratch_operands = 1 : i64, tpu.core_type = #tpu.core_type<tc>, window_params = [{transform_indices = @transform_0, window_bounds = array<i64: 1, 1, 2, 16>}, {transform_indices = @transform_1, window_bounds = array<i64: 1, 1, 2, 16>}, {transform_indices = @transform_2, window_bounds = array<i64: 1, 1, 2, 16>}, {pipeline_mode = #tpu.pipeline_mode<synchronous>, transform_indices = @transform_3, window_bounds = array<i64: 2, 1>}, {transform_indices = @transform_4, window_bounds = array<i64: 1, 2, 16>}, {transform_indices = @transform_5, window_bounds = array<i64: 1, 16, 16>}, {transform_indices = @transform_6, window_bounds = array<i64: 1, 16, 16>}, {transform_indices = @transform_7, window_bounds = array<i64: 1, 16, 16>}, {transform_indices = @transform_8, window_bounds = array<i64: 1, 1, 16>}, {transform_indices = @transform_9, window_bounds = array<i64: 1, 1, 16>}, {transform_indices = @transform_10, window_bounds = array<i64: 1, 1, 16>}, {transform_indices = @transform_11, window_bounds = array<i64: 1, 1, 2, 16>}, {transform_indices = @transform_12, window_bounds = array<i64: 1, 2, 16>}]} {
    %c1_i32 = arith.constant 1 : i32
    %0 = arith.subi %c1_i32, %arg0 : i32
    %1 = arith.muli %0, %arg1 : i32
    %c7_i32 = arith.constant 7 : i32
    %2 = arith.subi %c7_i32, %arg1 : i32
    %3 = arith.muli %arg0, %2 : i32
    %4 = arith.addi %1, %3 : i32
    %c0_i32 = arith.constant 0 : i32
    %5 = arith.cmpi eq, %arg1, %c0_i32 : i32
    %6 = arith.extui %5 : i1 to i32
    %c0_i32_0 = arith.constant 0 : i32
    %7 = arith.cmpi ne, %6, %c0_i32_0 : i32
    scf.if %7 {
      %c0_48 = arith.constant 0 : index
      %c0_49 = arith.constant 0 : index
      %c0_50 = arith.constant 0 : index
      %75 = vector.load %arg6[%c0_48, %c0_49, %c0_50] : memref<1x2x16xf32, #tpu.memory_space<vmem>>, vector<1x2x16xf32>
      %76 = vector.shape_cast %75 : vector<1x2x16xf32> to vector<2x16xf32>
      %c0_51 = arith.constant 0 : index
      %c0_52 = arith.constant 0 : index
      %77 = vector.load %arg15[%c0_51, %c0_52] : memref<2x16xf32, #tpu.memory_space<vmem>>, vector<2x16xf32>
      tpu.vector_store %arg15[%c0_51, %c0_52], %76 {strides = array<i32>} : memref<2x16xf32, #tpu.memory_space<vmem>>, vector<2x16xf32>,
    } else {
    }
    %c0 = arith.constant 0 : index
    %c0_1 = arith.constant 0 : index
    %8 = vector.load %arg15[%c0, %c0_1] : memref<2x16xf32, #tpu.memory_space<vmem>>, vector<2x16xf32>
    %9 = arith.truncf %8 : vector<2x16xf32> to vector<2x16xbf16>
    %c0_2 = arith.constant 0 : index
    %c0_3 = arith.constant 0 : index
    %c0_4 = arith.constant 0 : index
    %10 = vector.load %arg7[%c0_2, %c0_3, %c0_4] : memref<1x16x16xbf16, #tpu.memory_space<vmem>>, vector<1x16x16xbf16>
    %11 = vector.shape_cast %10 : vector<1x16x16xbf16> to vector<16x16xbf16>
    %cst = arith.constant dense<0.000000e+00> : vector<2x16xf32>
    %12 = tpu.matmul %9, %11, %cst {dimension_numbers = #tpu.dot_dimension_numbers<[1], [0], [0], [1], [0, 0, 1, 1], [], []>} : vector<2x16xbf16>, vector<16x16xbf16>, vector<2x16xf32> -> vector<2x16xf32>
    %c0_5 = arith.constant 0 : index
    %c0_6 = arith.constant 0 : index
    %c0_7 = arith.constant 0 : index
    %13 = vector.load %arg10[%c0_5, %c0_6, %c0_7] : memref<1x1x16xf32, #tpu.memory_space<vmem>>, vector<1x1x16xf32>
    %14 = vector.shape_cast %13 : vector<1x1x16xf32> to vector<1x16xf32>
    %15 = vector.broadcast %14 : vector<1x16xf32> to vector<2x16xf32>
    %16 = arith.addf %12, %15 : vector<2x16xf32>
    %c0_8 = arith.constant 0 : index
    %c0_9 = arith.constant 0 : index
    %c0_10 = arith.constant 0 : index
    %17 = vector.load %arg8[%c0_8, %c0_9, %c0_10] : memref<1x16x16xbf16, #tpu.memory_space<vmem>>, vector<1x16x16xbf16>
    %18 = vector.shape_cast %17 : vector<1x16x16xbf16> to vector<16x16xbf16>
    %cst_11 = arith.constant dense<0.000000e+00> : vector<2x16xf32>
    %19 = tpu.matmul %9, %18, %cst_11 {dimension_numbers = #tpu.dot_dimension_numbers<[1], [0], [0], [1], [0, 0, 1, 1], [], []>} : vector<2x16xbf16>, vector<16x16xbf16>, vector<2x16xf32> -> vector<2x16xf32>
    %c0_12 = arith.constant 0 : index
    %c0_13 = arith.constant 0 : index
    %c0_14 = arith.constant 0 : index
    %20 = vector.load %arg11[%c0_12, %c0_13, %c0_14] : memref<1x1x16xf32, #tpu.memory_space<vmem>>, vector<1x1x16xf32>
    %21 = vector.shape_cast %20 : vector<1x1x16xf32> to vector<1x16xf32>
    %22 = vector.broadcast %21 : vector<1x16xf32> to vector<2x16xf32>
    %23 = arith.addf %19, %22 : vector<2x16xf32>
    %c0_15 = arith.constant 0 : index
    %c0_16 = arith.constant 0 : index
    %c0_17 = arith.constant 0 : index
    %24 = vector.load %arg9[%c0_15, %c0_16, %c0_17] : memref<1x16x16xbf16, #tpu.memory_space<vmem>>, vector<1x16x16xbf16>
    %25 = vector.shape_cast %24 : vector<1x16x16xbf16> to vector<16x16xbf16>
    %cst_18 = arith.constant dense<0.000000e+00> : vector<2x16xf32>
    %26 = tpu.matmul %9, %25, %cst_18 {dimension_numbers = #tpu.dot_dimension_numbers<[1], [0], [0], [1], [0, 0, 1, 1], [], []>} : vector<2x16xbf16>, vector<16x16xbf16>, vector<2x16xf32> -> vector<2x16xf32>
    %c0_19 = arith.constant 0 : index
    %c0_20 = arith.constant 0 : index
    %c0_21 = arith.constant 0 : index
    %27 = vector.load %arg12[%c0_19, %c0_20, %c0_21] : memref<1x1x16xf32, #tpu.memory_space<vmem>>, vector<1x1x16xf32>
    %28 = vector.shape_cast %27 : vector<1x1x16xf32> to vector<1x16xf32>
    %29 = vector.broadcast %28 : vector<1x16xf32> to vector<2x16xf32>
    %30 = arith.addf %26, %29 : vector<2x16xf32>
    %c0_22 = arith.constant 0 : index
    %c0_23 = arith.constant 0 : index
    %c0_24 = arith.constant 0 : index
    %c0_25 = arith.constant 0 : index
    %31 = vector.load %arg2[%c0_22, %c0_23, %c0_24, %c0_25] : memref<1x1x2x16xf32, #tpu.memory_space<vmem>>, vector<1x1x2x16xf32>
    %32 = vector.shape_cast %31 : vector<1x1x2x16xf32> to vector<2x16xf32>
    %33 = arith.addf %32, %16 : vector<2x16xf32>
    %34 = arith.negf %33 : vector<2x16xf32>
    %35 = math.exp %34 : vector<2x16xf32>
    %cst_26 = arith.constant 1.000000e+00 : f32
    %36 = vector.broadcast %cst_26 : f32 to vector<2x16xf32>
    %37 = arith.addf %36, %35 : vector<2x16xf32>
    %38 = arith.divf %36, %37 : vector<2x16xf32>
    %c0_27 = arith.constant 0 : index
    %c0_28 = arith.constant 0 : index
    %c0_29 = arith.constant 0 : index
    %c0_30 = arith.constant 0 : index
    %39 = vector.load %arg3[%c0_27, %c0_28, %c0_29, %c0_30] : memref<1x1x2x16xf32, #tpu.memory_space<vmem>>, vector<1x1x2x16xf32>
    %40 = vector.shape_cast %39 : vector<1x1x2x16xf32> to vector<2x16xf32>
    %41 = arith.addf %40, %23 : vector<2x16xf32>
    %42 = arith.negf %41 : vector<2x16xf32>
    %43 = math.exp %42 : vector<2x16xf32>
    %cst_31 = arith.constant 1.000000e+00 : f32
    %44 = vector.broadcast %cst_31 : f32 to vector<2x16xf32>
    %45 = arith.addf %44, %43 : vector<2x16xf32>
    %46 = arith.divf %44, %45 : vector<2x16xf32>
    %c0_32 = arith.constant 0 : index
    %c0_33 = arith.constant 0 : index
    %c0_34 = arith.constant 0 : index
    %c0_35 = arith.constant 0 : index
    %47 = vector.load %arg4[%c0_32, %c0_33, %c0_34, %c0_35] : memref<1x1x2x16xf32, #tpu.memory_space<vmem>>, vector<1x1x2x16xf32>
    %48 = vector.shape_cast %47 : vector<1x1x2x16xf32> to vector<2x16xf32>
    %49 = arith.mulf %38, %30 : vector<2x16xf32>
    %50 = arith.addf %48, %49 : vector<2x16xf32>
    %51 = math.tanh %50 : vector<2x16xf32>
    %cst_36 = arith.constant 1.000000e+00 : f32
    %52 = vector.broadcast %cst_36 : f32 to vector<2x16xf32>
    %53 = arith.subf %52, %46 : vector<2x16xf32>
    %54 = arith.mulf %53, %51 : vector<2x16xf32>
    %55 = arith.mulf %46, %8 : vector<2x16xf32>
    %56 = arith.addf %54, %55 : vector<2x16xf32>
    %c0_37 = arith.constant 0 : index
    %c0_38 = arith.constant 0 : index
    %57 = vector.load %arg5[%c0_37, %c0_38] : memref<2x1xi32, #tpu.memory_space<vmem>>, vector<2x1xi32>
    %58 = vector.broadcast %4 : i32 to vector<2x1xi32>
    %59 = arith.cmpi slt, %58, %57 : vector<2x1xi32>
    %60 = vector.shape_cast %59 : vector<2x1xi1> to vector<2x1xi1>
    %61 = vector.broadcast %60 : vector<2x1xi1> to vector<2x16xi1>
    %62 = arith.select %61, %56, %8 : vector<2x16xi1>, vector<2x16xf32>
    %c0_39 = arith.constant 0 : index
    %c0_40 = arith.constant 0 : index
    %63 = vector.load %arg15[%c0_39, %c0_40] : memref<2x16xf32, #tpu.memory_space<vmem>>, vector<2x16xf32>
    tpu.vector_store %arg15[%c0_39, %c0_40], %62 {strides = array<i32>} : memref<2x16xf32, #tpu.memory_space<vmem>>, vector<2x16xf32>,
    %cst_41 = arith.constant 0.000000e+00 : f32
    %64 = vector.shape_cast %59 : vector<2x1xi1> to vector<2x1xi1>
    %65 = vector.broadcast %64 : vector<2x1xi1> to vector<2x16xi1>
    %66 = vector.broadcast %cst_41 : f32 to vector<2x16xf32>
    %67 = arith.select %65, %62, %66 : vector<2x16xi1>, vector<2x16xf32>
    %68 = arith.truncf %67 : vector<2x16xf32> to vector<2x16xbf16>
    %c0_42 = arith.constant 0 : index
    %c0_43 = arith.constant 0 : index
    %c0_44 = arith.constant 0 : index
    %c0_45 = arith.constant 0 : index
    %69 = vector.load %arg13[%c0_42, %c0_43, %c0_44, %c0_45] : memref<1x1x2x16xbf16, #tpu.memory_space<vmem>>, vector<1x1x2x16xbf16>
    %70 = vector.shape_cast %69 : vector<1x1x2x16xbf16> to vector<2x16xbf16>
    %71 = vector.shape_cast %68 : vector<2x16xbf16> to vector<1x1x2x16xbf16>
    tpu.vector_store %arg13[%c0_42, %c0_43, %c0_44, %c0_45], %71 {strides = array<i32>} : memref<1x1x2x16xbf16, #tpu.memory_space<vmem>>, vector<1x1x2x16xbf16>,
    %c7_i32_46 = arith.constant 7 : i32
    %72 = arith.cmpi eq, %arg1, %c7_i32_46 : i32
    %73 = arith.extui %72 : i1 to i32
    %c0_i32_47 = arith.constant 0 : i32
    %74 = arith.cmpi ne, %73, %c0_i32_47 : i32
    scf.if %74 {
      %c0_48 = arith.constant 0 : index
      %c0_49 = arith.constant 0 : index
      %c0_50 = arith.constant 0 : index
      %75 = vector.load %arg14[%c0_48, %c0_49, %c0_50] : memref<1x2x16xf32, #tpu.memory_space<vmem>>, vector<1x2x16xf32>
      %76 = vector.shape_cast %75 : vector<1x2x16xf32> to vector<2x16xf32>
      %77 = vector.shape_cast %62 : vector<2x16xf32> to vector<1x2x16xf32>
      tpu.vector_store %arg14[%c0_48, %c0_49, %c0_50], %77 {strides = array<i32>} : memref<1x2x16xf32, #tpu.memory_space<vmem>>, vector<1x2x16xf32>,
    } else {
    }
    return
  }
  func.func @transform_0(%arg0: i32, %arg1: i32) -> (i32, i32, i32, i32) {
    %c1_i32 = arith.constant 1 : i32
    %0 = arith.subi %c1_i32, %arg0 : i32
    %1 = arith.muli %0, %arg1 : i32
    %c7_i32 = arith.constant 7 : i32
    %2 = arith.subi %c7_i32, %arg1 : i32
    %3 = arith.muli %arg0, %2 : i32
    %4 = arith.addi %1, %3 : i32
    %c0_i32 = arith.constant 0 : i32
    %c0_i32_0 = arith.constant 0 : i32
    %c0_i32_1 = arith.constant 0 : i32
    return %arg0, %4, %c0_i32, %c0_i32_0 : i32, i32, i32, i32
  }
  func.func @transform_1(%arg0: i32, %arg1: i32) -> (i32, i32, i32, i32) {
    %c1_i32 = arith.constant 1 : i32
    %0 = arith.subi %c1_i32, %arg0 : i32
    %1 = arith.muli %0, %arg1 : i32
    %c7_i32 = arith.constant 7 : i32
    %2 = arith.subi %c7_i32, %arg1 : i32
    %3 = arith.muli %arg0, %2 : i32
    %4 = arith.addi %1, %3 : i32
    %c0_i32 = arith.constant 0 : i32
    %c0_i32_0 = arith.constant 0 : i32
    %c0_i32_1 = arith.constant 0 : i32
    return %arg0, %4, %c0_i32, %c0_i32_0 : i32, i32, i32, i32
  }
  func.func @transform_2(%arg0: i32, %arg1: i32) -> (i32, i32, i32, i32) {
    %c1_i32 = arith.constant 1 : i32
    %0 = arith.subi %c1_i32, %arg0 : i32
    %1 = arith.muli %0, %arg1 : i32
    %c7_i32 = arith.constant 7 : i32
    %2 = arith.subi %c7_i32, %arg1 : i32
    %3 = arith.muli %arg0, %2 : i32
    %4 = arith.addi %1, %3 : i32
    %c0_i32 = arith.constant 0 : i32
    %c0_i32_0 = arith.constant 0 : i32
    %c0_i32_1 = arith.constant 0 : i32
    return %arg0, %4, %c0_i32, %c0_i32_0 : i32, i32, i32, i32
  }
  func.func @transform_3(%arg0: i32, %arg1: i32) -> (i32, i32) {
    %c0_i32 = arith.constant 0 : i32
    %c0_i32_0 = arith.constant 0 : i32
    %c0_i32_1 = arith.constant 0 : i32
    return %c0_i32, %c0_i32_0 : i32, i32
  }
  func.func @transform_4(%arg0: i32, %arg1: i32) -> (i32, i32, i32) {
    %c0_i32 = arith.constant 0 : i32
    %c0_i32_0 = arith.constant 0 : i32
    %c0_i32_1 = arith.constant 0 : i32
    return %arg0, %c0_i32, %c0_i32_0 : i32, i32, i32
  }
  func.func @transform_5(%arg0: i32, %arg1: i32) -> (i32, i32, i32) {
    %c0_i32 = arith.constant 0 : i32
    %c0_i32_0 = arith.constant 0 : i32
    %c0_i32_1 = arith.constant 0 : i32
    return %arg0, %c0_i32, %c0_i32_0 : i32, i32, i32
  }
  func.func @transform_6(%arg0: i32, %arg1: i32) -> (i32, i32, i32) {
    %c0_i32 = arith.constant 0 : i32
    %c0_i32_0 = arith.constant 0 : i32
    %c0_i32_1 = arith.constant 0 : i32
    return %arg0, %c0_i32, %c0_i32_0 : i32, i32, i32
  }
  func.func @transform_7(%arg0: i32, %arg1: i32) -> (i32, i32, i32) {
    %c0_i32 = arith.constant 0 : i32
    %c0_i32_0 = arith.constant 0 : i32
    %c0_i32_1 = arith.constant 0 : i32
    return %arg0, %c0_i32, %c0_i32_0 : i32, i32, i32
  }
  func.func @transform_8(%arg0: i32, %arg1: i32) -> (i32, i32, i32) {
    %c0_i32 = arith.constant 0 : i32
    %c0_i32_0 = arith.constant 0 : i32
    %c0_i32_1 = arith.constant 0 : i32
    return %arg0, %c0_i32, %c0_i32_0 : i32, i32, i32
  }
  func.func @transform_9(%arg0: i32, %arg1: i32) -> (i32, i32, i32) {
    %c0_i32 = arith.constant 0 : i32
    %c0_i32_0 = arith.constant 0 : i32
    %c0_i32_1 = arith.constant 0 : i32
    return %arg0, %c0_i32, %c0_i32_0 : i32, i32, i32
  }
  func.func @transform_10(%arg0: i32, %arg1: i32) -> (i32, i32, i32) {
    %c0_i32 = arith.constant 0 : i32
    %c0_i32_0 = arith.constant 0 : i32
    %c0_i32_1 = arith.constant 0 : i32
    return %arg0, %c0_i32, %c0_i32_0 : i32, i32, i32
  }
  func.func @transform_11(%arg0: i32, %arg1: i32) -> (i32, i32, i32, i32) {
    %c1_i32 = arith.constant 1 : i32
    %0 = arith.subi %c1_i32, %arg0 : i32
    %1 = arith.muli %0, %arg1 : i32
    %c7_i32 = arith.constant 7 : i32
    %2 = arith.subi %c7_i32, %arg1 : i32
    %3 = arith.muli %arg0, %2 : i32
    %4 = arith.addi %1, %3 : i32
    %c0_i32 = arith.constant 0 : i32
    %c0_i32_0 = arith.constant 0 : i32
    %c0_i32_1 = arith.constant 0 : i32
    return %arg0, %4, %c0_i32, %c0_i32_0 : i32, i32, i32, i32
  }
  func.func @transform_12(%arg0: i32, %arg1: i32) -> (i32, i32, i32) {
    %c0_i32 = arith.constant 0 : i32
    %c0_i32_0 = arith.constant 0 : i32
    %c0_i32_1 = arith.constant 0 : i32
    return %arg0, %c0_i32, %c0_i32_0 : i32, i32, i32
  }
}

module attributes {stable_mosaic.version = 11 : i64} {
  func.func @_bridge_kernel(%arg0: memref<2x16xbf16, #tpu.memory_space<vmem>>, %arg1: memref<2x16xbf16, #tpu.memory_space<vmem>>, %arg2: memref<16x16xbf16, #tpu.memory_space<vmem>>, %arg3: memref<16x16xbf16, #tpu.memory_space<vmem>>, %arg4: memref<1x16xf32, #tpu.memory_space<vmem>>, %arg5: memref<2x16xf32, #tpu.memory_space<vmem>>) attributes {dimension_semantics = [], scalar_prefetch = 0 : i64, scratch_operands = 0 : i64, tpu.core_type = #tpu.core_type<tc>} {
    %c0 = arith.constant 0 : index
    %c0_0 = arith.constant 0 : index
    %0 = vector.load %arg0[%c0, %c0_0] : memref<2x16xbf16, #tpu.memory_space<vmem>>, vector<2x16xbf16>
    %c0_1 = arith.constant 0 : index
    %c0_2 = arith.constant 0 : index
    %1 = vector.load %arg2[%c0_1, %c0_2] : memref<16x16xbf16, #tpu.memory_space<vmem>>, vector<16x16xbf16>
    %cst = arith.constant dense<0.000000e+00> : vector<2x16xf32>
    %2 = tpu.matmul %0, %1, %cst {dimension_numbers = #tpu.dot_dimension_numbers<[1], [0], [0], [1], [0, 0, 1, 1], [], []>} : vector<2x16xbf16>, vector<16x16xbf16>, vector<2x16xf32> -> vector<2x16xf32>
    %c0_3 = arith.constant 0 : index
    %c0_4 = arith.constant 0 : index
    %3 = vector.load %arg1[%c0_3, %c0_4] : memref<2x16xbf16, #tpu.memory_space<vmem>>, vector<2x16xbf16>
    %c0_5 = arith.constant 0 : index
    %c0_6 = arith.constant 0 : index
    %4 = vector.load %arg3[%c0_5, %c0_6] : memref<16x16xbf16, #tpu.memory_space<vmem>>, vector<16x16xbf16>
    %cst_7 = arith.constant dense<0.000000e+00> : vector<2x16xf32>
    %5 = tpu.matmul %3, %4, %cst_7 {dimension_numbers = #tpu.dot_dimension_numbers<[1], [0], [0], [1], [0, 0, 1, 1], [], []>} : vector<2x16xbf16>, vector<16x16xbf16>, vector<2x16xf32> -> vector<2x16xf32>
    %6 = arith.addf %2, %5 : vector<2x16xf32>
    %c0_8 = arith.constant 0 : index
    %c0_9 = arith.constant 0 : index
    %7 = vector.load %arg4[%c0_8, %c0_9] : memref<1x16xf32, #tpu.memory_space<vmem>>, vector<1x16xf32>
    %8 = vector.broadcast %7 : vector<1x16xf32> to vector<2x16xf32>
    %9 = arith.addf %6, %8 : vector<2x16xf32>
    %10 = math.tanh %9 : vector<2x16xf32>
    %c0_10 = arith.constant 0 : index
    %c0_11 = arith.constant 0 : index
    %11 = vector.load %arg5[%c0_10, %c0_11] : memref<2x16xf32, #tpu.memory_space<vmem>>, vector<2x16xf32>
    tpu.vector_store %arg5[%c0_10, %c0_11], %10 {strides = array<i32>} : memref<2x16xf32, #tpu.memory_space<vmem>>, vector<2x16xf32>,
    return
  }
}

module attributes {stable_mosaic.version = 11 : i64} {
  func.func @_gi_kernel(%arg0: i32, %arg1: memref<12x8xbf16, #tpu.memory_space<vmem>>, %arg2: memref<1x8x16xbf16, #tpu.memory_space<vmem>>, %arg3: memref<1x8x16xbf16, #tpu.memory_space<vmem>>, %arg4: memref<1x8x16xbf16, #tpu.memory_space<vmem>>, %arg5: memref<1x1x16xf32, #tpu.memory_space<vmem>>, %arg6: memref<1x1x16xf32, #tpu.memory_space<vmem>>, %arg7: memref<1x1x16xf32, #tpu.memory_space<vmem>>, %arg8: memref<1x12x16xf32, #tpu.memory_space<vmem>>, %arg9: memref<1x12x16xf32, #tpu.memory_space<vmem>>, %arg10: memref<1x12x16xf32, #tpu.memory_space<vmem>>) attributes {dimension_semantics = [#tpu.dimension_semantics<parallel>], iteration_bounds = array<i64: 1>, scalar_prefetch = 0 : i64, scratch_operands = 0 : i64, tpu.core_type = #tpu.core_type<tc>, window_params = [{pipeline_mode = #tpu.pipeline_mode<synchronous>, transform_indices = @transform_0, window_bounds = array<i64: 12, 8>}, {transform_indices = @transform_1, window_bounds = array<i64: 1, 8, 16>}, {transform_indices = @transform_2, window_bounds = array<i64: 1, 8, 16>}, {transform_indices = @transform_3, window_bounds = array<i64: 1, 8, 16>}, {transform_indices = @transform_4, window_bounds = array<i64: 1, 1, 16>}, {transform_indices = @transform_5, window_bounds = array<i64: 1, 1, 16>}, {transform_indices = @transform_6, window_bounds = array<i64: 1, 1, 16>}, {transform_indices = @transform_7, window_bounds = array<i64: 1, 12, 16>}, {transform_indices = @transform_8, window_bounds = array<i64: 1, 12, 16>}, {transform_indices = @transform_9, window_bounds = array<i64: 1, 12, 16>}]} {
    %c0 = arith.constant 0 : index
    %c0_0 = arith.constant 0 : index
    %0 = vector.load %arg1[%c0, %c0_0] : memref<12x8xbf16, #tpu.memory_space<vmem>>, vector<12x8xbf16>
    %c0_1 = arith.constant 0 : index
    %c0_2 = arith.constant 0 : index
    %c0_3 = arith.constant 0 : index
    %1 = vector.load %arg2[%c0_1, %c0_2, %c0_3] : memref<1x8x16xbf16, #tpu.memory_space<vmem>>, vector<1x8x16xbf16>
    %2 = vector.shape_cast %1 : vector<1x8x16xbf16> to vector<8x16xbf16>
    %cst = arith.constant dense<0.000000e+00> : vector<12x16xf32>
    %3 = tpu.matmul %0, %2, %cst {dimension_numbers = #tpu.dot_dimension_numbers<[1], [0], [0], [1], [0, 0, 1, 1], [], []>} : vector<12x8xbf16>, vector<8x16xbf16>, vector<12x16xf32> -> vector<12x16xf32>
    %c0_4 = arith.constant 0 : index
    %c0_5 = arith.constant 0 : index
    %c0_6 = arith.constant 0 : index
    %4 = vector.load %arg5[%c0_4, %c0_5, %c0_6] : memref<1x1x16xf32, #tpu.memory_space<vmem>>, vector<1x1x16xf32>
    %5 = vector.shape_cast %4 : vector<1x1x16xf32> to vector<1x16xf32>
    %6 = vector.broadcast %5 : vector<1x16xf32> to vector<12x16xf32>
    %7 = arith.addf %3, %6 : vector<12x16xf32>
    %c0_7 = arith.constant 0 : index
    %c0_8 = arith.constant 0 : index
    %c0_9 = arith.constant 0 : index
    %8 = vector.load %arg8[%c0_7, %c0_8, %c0_9] : memref<1x12x16xf32, #tpu.memory_space<vmem>>, vector<1x12x16xf32>
    %9 = vector.shape_cast %8 : vector<1x12x16xf32> to vector<12x16xf32>
    %10 = vector.shape_cast %7 : vector<12x16xf32> to vector<1x12x16xf32>
    tpu.vector_store %arg8[%c0_7, %c0_8, %c0_9], %10 {strides = array<i32>} : memref<1x12x16xf32, #tpu.memory_space<vmem>>, vector<1x12x16xf32>,
    %c0_10 = arith.constant 0 : index
    %c0_11 = arith.constant 0 : index
    %c0_12 = arith.constant 0 : index
    %11 = vector.load %arg3[%c0_10, %c0_11, %c0_12] : memref<1x8x16xbf16, #tpu.memory_space<vmem>>, vector<1x8x16xbf16>
    %12 = vector.shape_cast %11 : vector<1x8x16xbf16> to vector<8x16xbf16>
    %cst_13 = arith.constant dense<0.000000e+00> : vector<12x16xf32>
    %13 = tpu.matmul %0, %12, %cst_13 {dimension_numbers = #tpu.dot_dimension_numbers<[1], [0], [0], [1], [0, 0, 1, 1], [], []>} : vector<12x8xbf16>, vector<8x16xbf16>, vector<12x16xf32> -> vector<12x16xf32>
    %c0_14 = arith.constant 0 : index
    %c0_15 = arith.constant 0 : index
    %c0_16 = arith.constant 0 : index
    %14 = vector.load %arg6[%c0_14, %c0_15, %c0_16] : memref<1x1x16xf32, #tpu.memory_space<vmem>>, vector<1x1x16xf32>
    %15 = vector.shape_cast %14 : vector<1x1x16xf32> to vector<1x16xf32>
    %16 = vector.broadcast %15 : vector<1x16xf32> to vector<12x16xf32>
    %17 = arith.addf %13, %16 : vector<12x16xf32>
    %c0_17 = arith.constant 0 : index
    %c0_18 = arith.constant 0 : index
    %c0_19 = arith.constant 0 : index
    %18 = vector.load %arg9[%c0_17, %c0_18, %c0_19] : memref<1x12x16xf32, #tpu.memory_space<vmem>>, vector<1x12x16xf32>
    %19 = vector.shape_cast %18 : vector<1x12x16xf32> to vector<12x16xf32>
    %20 = vector.shape_cast %17 : vector<12x16xf32> to vector<1x12x16xf32>
    tpu.vector_store %arg9[%c0_17, %c0_18, %c0_19], %20 {strides = array<i32>} : memref<1x12x16xf32, #tpu.memory_space<vmem>>, vector<1x12x16xf32>,
    %c0_20 = arith.constant 0 : index
    %c0_21 = arith.constant 0 : index
    %c0_22 = arith.constant 0 : index
    %21 = vector.load %arg4[%c0_20, %c0_21, %c0_22] : memref<1x8x16xbf16, #tpu.memory_space<vmem>>, vector<1x8x16xbf16>
    %22 = vector.shape_cast %21 : vector<1x8x16xbf16> to vector<8x16xbf16>
    %cst_23 = arith.constant dense<0.000000e+00> : vector<12x16xf32>
    %23 = tpu.matmul %0, %22, %cst_23 {dimension_numbers = #tpu.dot_dimension_numbers<[1], [0], [0], [1], [0, 0, 1, 1], [], []>} : vector<12x8xbf16>, vector<8x16xbf16>, vector<12x16xf32> -> vector<12x16xf32>
    %c0_24 = arith.constant 0 : index
    %c0_25 = arith.constant 0 : index
    %c0_26 = arith.constant 0 : index
    %24 = vector.load %arg7[%c0_24, %c0_25, %c0_26] : memref<1x1x16xf32, #tpu.memory_space<vmem>>, vector<1x1x16xf32>
    %25 = vector.shape_cast %24 : vector<1x1x16xf32> to vector<1x16xf32>
    %26 = vector.broadcast %25 : vector<1x16xf32> to vector<12x16xf32>
    %27 = arith.addf %23, %26 : vector<12x16xf32>
    %c0_27 = arith.constant 0 : index
    %c0_28 = arith.constant 0 : index
    %c0_29 = arith.constant 0 : index
    %28 = vector.load %arg10[%c0_27, %c0_28, %c0_29] : memref<1x12x16xf32, #tpu.memory_space<vmem>>, vector<1x12x16xf32>
    %29 = vector.shape_cast %28 : vector<1x12x16xf32> to vector<12x16xf32>
    %30 = vector.shape_cast %27 : vector<12x16xf32> to vector<1x12x16xf32>
    tpu.vector_store %arg10[%c0_27, %c0_28, %c0_29], %30 {strides = array<i32>} : memref<1x12x16xf32, #tpu.memory_space<vmem>>, vector<1x12x16xf32>,
    return
  }
  func.func @transform_0(%arg0: i32) -> (i32, i32) {
    %c0_i32 = arith.constant 0 : i32
    %c0_i32_0 = arith.constant 0 : i32
    %c0_i32_1 = arith.constant 0 : i32
    return %c0_i32, %c0_i32_0 : i32, i32
  }
  func.func @transform_1(%arg0: i32) -> (i32, i32, i32) {
    %c0_i32 = arith.constant 0 : i32
    %c0_i32_0 = arith.constant 0 : i32
    %c0_i32_1 = arith.constant 0 : i32
    return %arg0, %c0_i32, %c0_i32_0 : i32, i32, i32
  }
  func.func @transform_2(%arg0: i32) -> (i32, i32, i32) {
    %c0_i32 = arith.constant 0 : i32
    %c0_i32_0 = arith.constant 0 : i32
    %c0_i32_1 = arith.constant 0 : i32
    return %arg0, %c0_i32, %c0_i32_0 : i32, i32, i32
  }
  func.func @transform_3(%arg0: i32) -> (i32, i32, i32) {
    %c0_i32 = arith.constant 0 : i32
    %c0_i32_0 = arith.constant 0 : i32
    %c0_i32_1 = arith.constant 0 : i32
    return %arg0, %c0_i32, %c0_i32_0 : i32, i32, i32
  }
  func.func @transform_4(%arg0: i32) -> (i32, i32, i32) {
    %c0_i32 = arith.constant 0 : i32
    %c0_i32_0 = arith.constant 0 : i32
    %c0_i32_1 = arith.constant 0 : i32
    return %arg0, %c0_i32, %c0_i32_0 : i32, i32, i32
  }
  func.func @transform_5(%arg0: i32) -> (i32, i32, i32) {
    %c0_i32 = arith.constant 0 : i32
    %c0_i32_0 = arith.constant 0 : i32
    %c0_i32_1 = arith.constant 0 : i32
    return %arg0, %c0_i32, %c0_i32_0 : i32, i32, i32
  }
  func.func @transform_6(%arg0: i32) -> (i32, i32, i32) {
    %c0_i32 = arith.constant 0 : i32
    %c0_i32_0 = arith.constant 0 : i32
    %c0_i32_1 = arith.constant 0 : i32
    return %arg0, %c0_i32, %c0_i32_0 : i32, i32, i32
  }
  func.func @transform_7(%arg0: i32) -> (i32, i32, i32) {
    %c0_i32 = arith.constant 0 : i32
    %c0_i32_0 = arith.constant 0 : i32
    %c0_i32_1 = arith.constant 0 : i32
    return %arg0, %c0_i32, %c0_i32_0 : i32, i32, i32
  }
  func.func @transform_8(%arg0: i32) -> (i32, i32, i32) {
    %c0_i32 = arith.constant 0 : i32
    %c0_i32_0 = arith.constant 0 : i32
    %c0_i32_1 = arith.constant 0 : i32
    return %arg0, %c0_i32, %c0_i32_0 : i32, i32, i32
  }
  func.func @transform_9(%arg0: i32) -> (i32, i32, i32) {
    %c0_i32 = arith.constant 0 : i32
    %c0_i32_0 = arith.constant 0 : i32
    %c0_i32_1 = arith.constant 0 : i32
    return %arg0, %c0_i32, %c0_i32_0 : i32, i32, i32
  }
}

module attributes {stable_mosaic.version = 11 : i64} {
  func.func @_gru_kernel(%arg0: i32, %arg1: i32, %arg2: memref<1x1x2x16xf32, #tpu.memory_space<vmem>>, %arg3: memref<1x1x2x16xf32, #tpu.memory_space<vmem>>, %arg4: memref<1x1x2x16xf32, #tpu.memory_space<vmem>>, %arg5: memref<2x1xi32, #tpu.memory_space<vmem>>, %arg6: memref<1x2x16xf32, #tpu.memory_space<vmem>>, %arg7: memref<1x16x16xbf16, #tpu.memory_space<vmem>>, %arg8: memref<1x16x16xbf16, #tpu.memory_space<vmem>>, %arg9: memref<1x16x16xbf16, #tpu.memory_space<vmem>>, %arg10: memref<1x1x16xf32, #tpu.memory_space<vmem>>, %arg11: memref<1x1x16xf32, #tpu.memory_space<vmem>>, %arg12: memref<1x1x16xf32, #tpu.memory_space<vmem>>, %arg13: memref<1x1x2x16xbf16, #tpu.memory_space<vmem>>, %arg14: memref<1x2x16xf32, #tpu.memory_space<vmem>>, %arg15: memref<2x16xf32, #tpu.memory_space<vmem>>) attributes {dimension_semantics = [#tpu.dimension_semantics<parallel>, #tpu.dimension_semantics<arbitrary>], iteration_bounds = array<i64: 1, 6>, scalar_prefetch = 0 : i64, scratch_operands = 1 : i64, tpu.core_type = #tpu.core_type<tc>, window_params = [{transform_indices = @transform_0, window_bounds = array<i64: 1, 1, 2, 16>}, {transform_indices = @transform_1, window_bounds = array<i64: 1, 1, 2, 16>}, {transform_indices = @transform_2, window_bounds = array<i64: 1, 1, 2, 16>}, {pipeline_mode = #tpu.pipeline_mode<synchronous>, transform_indices = @transform_3, window_bounds = array<i64: 2, 1>}, {transform_indices = @transform_4, window_bounds = array<i64: 1, 2, 16>}, {transform_indices = @transform_5, window_bounds = array<i64: 1, 16, 16>}, {transform_indices = @transform_6, window_bounds = array<i64: 1, 16, 16>}, {transform_indices = @transform_7, window_bounds = array<i64: 1, 16, 16>}, {transform_indices = @transform_8, window_bounds = array<i64: 1, 1, 16>}, {transform_indices = @transform_9, window_bounds = array<i64: 1, 1, 16>}, {transform_indices = @transform_10, window_bounds = array<i64: 1, 1, 16>}, {transform_indices = @transform_11, window_bounds = array<i64: 1, 1, 2, 16>}, {transform_indices = @transform_12, window_bounds = array<i64: 1, 2, 16>}]} {
    %c1_i32 = arith.constant 1 : i32
    %0 = arith.subi %c1_i32, %arg0 : i32
    %1 = arith.muli %0, %arg1 : i32
    %c5_i32 = arith.constant 5 : i32
    %2 = arith.subi %c5_i32, %arg1 : i32
    %3 = arith.muli %arg0, %2 : i32
    %4 = arith.addi %1, %3 : i32
    %c0_i32 = arith.constant 0 : i32
    %5 = arith.cmpi eq, %arg1, %c0_i32 : i32
    %6 = arith.extui %5 : i1 to i32
    %c0_i32_0 = arith.constant 0 : i32
    %7 = arith.cmpi ne, %6, %c0_i32_0 : i32
    scf.if %7 {
      %c0_48 = arith.constant 0 : index
      %c0_49 = arith.constant 0 : index
      %c0_50 = arith.constant 0 : index
      %75 = vector.load %arg6[%c0_48, %c0_49, %c0_50] : memref<1x2x16xf32, #tpu.memory_space<vmem>>, vector<1x2x16xf32>
      %76 = vector.shape_cast %75 : vector<1x2x16xf32> to vector<2x16xf32>
      %c0_51 = arith.constant 0 : index
      %c0_52 = arith.constant 0 : index
      %77 = vector.load %arg15[%c0_51, %c0_52] : memref<2x16xf32, #tpu.memory_space<vmem>>, vector<2x16xf32>
      tpu.vector_store %arg15[%c0_51, %c0_52], %76 {strides = array<i32>} : memref<2x16xf32, #tpu.memory_space<vmem>>, vector<2x16xf32>,
    } else {
    }
    %c0 = arith.constant 0 : index
    %c0_1 = arith.constant 0 : index
    %8 = vector.load %arg15[%c0, %c0_1] : memref<2x16xf32, #tpu.memory_space<vmem>>, vector<2x16xf32>
    %9 = arith.truncf %8 : vector<2x16xf32> to vector<2x16xbf16>
    %c0_2 = arith.constant 0 : index
    %c0_3 = arith.constant 0 : index
    %c0_4 = arith.constant 0 : index
    %10 = vector.load %arg7[%c0_2, %c0_3, %c0_4] : memref<1x16x16xbf16, #tpu.memory_space<vmem>>, vector<1x16x16xbf16>
    %11 = vector.shape_cast %10 : vector<1x16x16xbf16> to vector<16x16xbf16>
    %cst = arith.constant dense<0.000000e+00> : vector<2x16xf32>
    %12 = tpu.matmul %9, %11, %cst {dimension_numbers = #tpu.dot_dimension_numbers<[1], [0], [0], [1], [0, 0, 1, 1], [], []>} : vector<2x16xbf16>, vector<16x16xbf16>, vector<2x16xf32> -> vector<2x16xf32>
    %c0_5 = arith.constant 0 : index
    %c0_6 = arith.constant 0 : index
    %c0_7 = arith.constant 0 : index
    %13 = vector.load %arg10[%c0_5, %c0_6, %c0_7] : memref<1x1x16xf32, #tpu.memory_space<vmem>>, vector<1x1x16xf32>
    %14 = vector.shape_cast %13 : vector<1x1x16xf32> to vector<1x16xf32>
    %15 = vector.broadcast %14 : vector<1x16xf32> to vector<2x16xf32>
    %16 = arith.addf %12, %15 : vector<2x16xf32>
    %c0_8 = arith.constant 0 : index
    %c0_9 = arith.constant 0 : index
    %c0_10 = arith.constant 0 : index
    %17 = vector.load %arg8[%c0_8, %c0_9, %c0_10] : memref<1x16x16xbf16, #tpu.memory_space<vmem>>, vector<1x16x16xbf16>
    %18 = vector.shape_cast %17 : vector<1x16x16xbf16> to vector<16x16xbf16>
    %cst_11 = arith.constant dense<0.000000e+00> : vector<2x16xf32>
    %19 = tpu.matmul %9, %18, %cst_11 {dimension_numbers = #tpu.dot_dimension_numbers<[1], [0], [0], [1], [0, 0, 1, 1], [], []>} : vector<2x16xbf16>, vector<16x16xbf16>, vector<2x16xf32> -> vector<2x16xf32>
    %c0_12 = arith.constant 0 : index
    %c0_13 = arith.constant 0 : index
    %c0_14 = arith.constant 0 : index
    %20 = vector.load %arg11[%c0_12, %c0_13, %c0_14] : memref<1x1x16xf32, #tpu.memory_space<vmem>>, vector<1x1x16xf32>
    %21 = vector.shape_cast %20 : vector<1x1x16xf32> to vector<1x16xf32>
    %22 = vector.broadcast %21 : vector<1x16xf32> to vector<2x16xf32>
    %23 = arith.addf %19, %22 : vector<2x16xf32>
    %c0_15 = arith.constant 0 : index
    %c0_16 = arith.constant 0 : index
    %c0_17 = arith.constant 0 : index
    %24 = vector.load %arg9[%c0_15, %c0_16, %c0_17] : memref<1x16x16xbf16, #tpu.memory_space<vmem>>, vector<1x16x16xbf16>
    %25 = vector.shape_cast %24 : vector<1x16x16xbf16> to vector<16x16xbf16>
    %cst_18 = arith.constant dense<0.000000e+00> : vector<2x16xf32>
    %26 = tpu.matmul %9, %25, %cst_18 {dimension_numbers = #tpu.dot_dimension_numbers<[1], [0], [0], [1], [0, 0, 1, 1], [], []>} : vector<2x16xbf16>, vector<16x16xbf16>, vector<2x16xf32> -> vector<2x16xf32>
    %c0_19 = arith.constant 0 : index
    %c0_20 = arith.constant 0 : index
    %c0_21 = arith.constant 0 : index
    %27 = vector.load %arg12[%c0_19, %c0_20, %c0_21] : memref<1x1x16xf32, #tpu.memory_space<vmem>>, vector<1x1x16xf32>
    %28 = vector.shape_cast %27 : vector<1x1x16xf32> to vector<1x16xf32>
    %29 = vector.broadcast %28 : vector<1x16xf32> to vector<2x16xf32>
    %30 = arith.addf %26, %29 : vector<2x16xf32>
    %c0_22 = arith.constant 0 : index
    %c0_23 = arith.constant 0 : index
    %c0_24 = arith.constant 0 : index
    %c0_25 = arith.constant 0 : index
    %31 = vector.load %arg2[%c0_22, %c0_23, %c0_24, %c0_25] : memref<1x1x2x16xf32, #tpu.memory_space<vmem>>, vector<1x1x2x16xf32>
    %32 = vector.shape_cast %31 : vector<1x1x2x16xf32> to vector<2x16xf32>
    %33 = arith.addf %32, %16 : vector<2x16xf32>
    %34 = arith.negf %33 : vector<2x16xf32>
    %35 = math.exp %34 : vector<2x16xf32>
    %cst_26 = arith.constant 1.000000e+00 : f32
    %36 = vector.broadcast %cst_26 : f32 to vector<2x16xf32>
    %37 = arith.addf %36, %35 : vector<2x16xf32>
    %38 = arith.divf %36, %37 : vector<2x16xf32>
    %c0_27 = arith.constant 0 : index
    %c0_28 = arith.constant 0 : index
    %c0_29 = arith.constant 0 : index
    %c0_30 = arith.constant 0 : index
    %39 = vector.load %arg3[%c0_27, %c0_28, %c0_29, %c0_30] : memref<1x1x2x16xf32, #tpu.memory_space<vmem>>, vector<1x1x2x16xf32>
    %40 = vector.shape_cast %39 : vector<1x1x2x16xf32> to vector<2x16xf32>
    %41 = arith.addf %40, %23 : vector<2x16xf32>
    %42 = arith.negf %41 : vector<2x16xf32>
    %43 = math.exp %42 : vector<2x16xf32>
    %cst_31 = arith.constant 1.000000e+00 : f32
    %44 = vector.broadcast %cst_31 : f32 to vector<2x16xf32>
    %45 = arith.addf %44, %43 : vector<2x16xf32>
    %46 = arith.divf %44, %45 : vector<2x16xf32>
    %c0_32 = arith.constant 0 : index
    %c0_33 = arith.constant 0 : index
    %c0_34 = arith.constant 0 : index
    %c0_35 = arith.constant 0 : index
    %47 = vector.load %arg4[%c0_32, %c0_33, %c0_34, %c0_35] : memref<1x1x2x16xf32, #tpu.memory_space<vmem>>, vector<1x1x2x16xf32>
    %48 = vector.shape_cast %47 : vector<1x1x2x16xf32> to vector<2x16xf32>
    %49 = arith.mulf %38, %30 : vector<2x16xf32>
    %50 = arith.addf %48, %49 : vector<2x16xf32>
    %51 = math.tanh %50 : vector<2x16xf32>
    %cst_36 = arith.constant 1.000000e+00 : f32
    %52 = vector.broadcast %cst_36 : f32 to vector<2x16xf32>
    %53 = arith.subf %52, %46 : vector<2x16xf32>
    %54 = arith.mulf %53, %51 : vector<2x16xf32>
    %55 = arith.mulf %46, %8 : vector<2x16xf32>
    %56 = arith.addf %54, %55 : vector<2x16xf32>
    %c0_37 = arith.constant 0 : index
    %c0_38 = arith.constant 0 : index
    %57 = vector.load %arg5[%c0_37, %c0_38] : memref<2x1xi32, #tpu.memory_space<vmem>>, vector<2x1xi32>
    %58 = vector.broadcast %4 : i32 to vector<2x1xi32>
    %59 = arith.cmpi slt, %58, %57 : vector<2x1xi32>
    %60 = vector.shape_cast %59 : vector<2x1xi1> to vector<2x1xi1>
    %61 = vector.broadcast %60 : vector<2x1xi1> to vector<2x16xi1>
    %62 = arith.select %61, %56, %8 : vector<2x16xi1>, vector<2x16xf32>
    %c0_39 = arith.constant 0 : index
    %c0_40 = arith.constant 0 : index
    %63 = vector.load %arg15[%c0_39, %c0_40] : memref<2x16xf32, #tpu.memory_space<vmem>>, vector<2x16xf32>
    tpu.vector_store %arg15[%c0_39, %c0_40], %62 {strides = array<i32>} : memref<2x16xf32, #tpu.memory_space<vmem>>, vector<2x16xf32>,
    %cst_41 = arith.constant 0.000000e+00 : f32
    %64 = vector.shape_cast %59 : vector<2x1xi1> to vector<2x1xi1>
    %65 = vector.broadcast %64 : vector<2x1xi1> to vector<2x16xi1>
    %66 = vector.broadcast %cst_41 : f32 to vector<2x16xf32>
    %67 = arith.select %65, %62, %66 : vector<2x16xi1>, vector<2x16xf32>
    %68 = arith.truncf %67 : vector<2x16xf32> to vector<2x16xbf16>
    %c0_42 = arith.constant 0 : index
    %c0_43 = arith.constant 0 : index
    %c0_44 = arith.constant 0 : index
    %c0_45 = arith.constant 0 : index
    %69 = vector.load %arg13[%c0_42, %c0_43, %c0_44, %c0_45] : memref<1x1x2x16xbf16, #tpu.memory_space<vmem>>, vector<1x1x2x16xbf16>
    %70 = vector.shape_cast %69 : vector<1x1x2x16xbf16> to vector<2x16xbf16>
    %71 = vector.shape_cast %68 : vector<2x16xbf16> to vector<1x1x2x16xbf16>
    tpu.vector_store %arg13[%c0_42, %c0_43, %c0_44, %c0_45], %71 {strides = array<i32>} : memref<1x1x2x16xbf16, #tpu.memory_space<vmem>>, vector<1x1x2x16xbf16>,
    %c5_i32_46 = arith.constant 5 : i32
    %72 = arith.cmpi eq, %arg1, %c5_i32_46 : i32
    %73 = arith.extui %72 : i1 to i32
    %c0_i32_47 = arith.constant 0 : i32
    %74 = arith.cmpi ne, %73, %c0_i32_47 : i32
    scf.if %74 {
      %c0_48 = arith.constant 0 : index
      %c0_49 = arith.constant 0 : index
      %c0_50 = arith.constant 0 : index
      %75 = vector.load %arg14[%c0_48, %c0_49, %c0_50] : memref<1x2x16xf32, #tpu.memory_space<vmem>>, vector<1x2x16xf32>
      %76 = vector.shape_cast %75 : vector<1x2x16xf32> to vector<2x16xf32>
      %77 = vector.shape_cast %62 : vector<2x16xf32> to vector<1x2x16xf32>
      tpu.vector_store %arg14[%c0_48, %c0_49, %c0_50], %77 {strides = array<i32>} : memref<1x2x16xf32, #tpu.memory_space<vmem>>, vector<1x2x16xf32>,
    } else {
    }
    return
  }
  func.func @transform_0(%arg0: i32, %arg1: i32) -> (i32, i32, i32, i32) {
    %c1_i32 = arith.constant 1 : i32
    %0 = arith.subi %c1_i32, %arg0 : i32
    %1 = arith.muli %0, %arg1 : i32
    %c5_i32 = arith.constant 5 : i32
    %2 = arith.subi %c5_i32, %arg1 : i32
    %3 = arith.muli %arg0, %2 : i32
    %4 = arith.addi %1, %3 : i32
    %c0_i32 = arith.constant 0 : i32
    %c0_i32_0 = arith.constant 0 : i32
    %c0_i32_1 = arith.constant 0 : i32
    return %arg0, %4, %c0_i32, %c0_i32_0 : i32, i32, i32, i32
  }
  func.func @transform_1(%arg0: i32, %arg1: i32) -> (i32, i32, i32, i32) {
    %c1_i32 = arith.constant 1 : i32
    %0 = arith.subi %c1_i32, %arg0 : i32
    %1 = arith.muli %0, %arg1 : i32
    %c5_i32 = arith.constant 5 : i32
    %2 = arith.subi %c5_i32, %arg1 : i32
    %3 = arith.muli %arg0, %2 : i32
    %4 = arith.addi %1, %3 : i32
    %c0_i32 = arith.constant 0 : i32
    %c0_i32_0 = arith.constant 0 : i32
    %c0_i32_1 = arith.constant 0 : i32
    return %arg0, %4, %c0_i32, %c0_i32_0 : i32, i32, i32, i32
  }
  func.func @transform_2(%arg0: i32, %arg1: i32) -> (i32, i32, i32, i32) {
    %c1_i32 = arith.constant 1 : i32
    %0 = arith.subi %c1_i32, %arg0 : i32
    %1 = arith.muli %0, %arg1 : i32
    %c5_i32 = arith.constant 5 : i32
    %2 = arith.subi %c5_i32, %arg1 : i32
    %3 = arith.muli %arg0, %2 : i32
    %4 = arith.addi %1, %3 : i32
    %c0_i32 = arith.constant 0 : i32
    %c0_i32_0 = arith.constant 0 : i32
    %c0_i32_1 = arith.constant 0 : i32
    return %arg0, %4, %c0_i32, %c0_i32_0 : i32, i32, i32, i32
  }
  func.func @transform_3(%arg0: i32, %arg1: i32) -> (i32, i32) {
    %c0_i32 = arith.constant 0 : i32
    %c0_i32_0 = arith.constant 0 : i32
    %c0_i32_1 = arith.constant 0 : i32
    return %c0_i32, %c0_i32_0 : i32, i32
  }
  func.func @transform_4(%arg0: i32, %arg1: i32) -> (i32, i32, i32) {
    %c0_i32 = arith.constant 0 : i32
    %c0_i32_0 = arith.constant 0 : i32
    %c0_i32_1 = arith.constant 0 : i32
    return %arg0, %c0_i32, %c0_i32_0 : i32, i32, i32
  }
  func.func @transform_5(%arg0: i32, %arg1: i32) -> (i32, i32, i32) {
    %c0_i32 = arith.constant 0 : i32
    %c0_i32_0 = arith.constant 0 : i32
    %c0_i32_1 = arith.constant 0 : i32
    return %arg0, %c0_i32, %c0_i32_0 : i32, i32, i32
  }
  func.func @transform_6(%arg0: i32, %arg1: i32) -> (i32, i32, i32) {
    %c0_i32 = arith.constant 0 : i32
    %c0_i32_0 = arith.constant 0 : i32
    %c0_i32_1 = arith.constant 0 : i32
    return %arg0, %c0_i32, %c0_i32_0 : i32, i32, i32
  }
  func.func @transform_7(%arg0: i32, %arg1: i32) -> (i32, i32, i32) {
    %c0_i32 = arith.constant 0 : i32
    %c0_i32_0 = arith.constant 0 : i32
    %c0_i32_1 = arith.constant 0 : i32
    return %arg0, %c0_i32, %c0_i32_0 : i32, i32, i32
  }
  func.func @transform_8(%arg0: i32, %arg1: i32) -> (i32, i32, i32) {
    %c0_i32 = arith.constant 0 : i32
    %c0_i32_0 = arith.constant 0 : i32
    %c0_i32_1 = arith.constant 0 : i32
    return %arg0, %c0_i32, %c0_i32_0 : i32, i32, i32
  }
  func.func @transform_9(%arg0: i32, %arg1: i32) -> (i32, i32, i32) {
    %c0_i32 = arith.constant 0 : i32
    %c0_i32_0 = arith.constant 0 : i32
    %c0_i32_1 = arith.constant 0 : i32
    return %arg0, %c0_i32, %c0_i32_0 : i32, i32, i32
  }
  func.func @transform_10(%arg0: i32, %arg1: i32) -> (i32, i32, i32) {
    %c0_i32 = arith.constant 0 : i32
    %c0_i32_0 = arith.constant 0 : i32
    %c0_i32_1 = arith.constant 0 : i32
    return %arg0, %c0_i32, %c0_i32_0 : i32, i32, i32
  }
  func.func @transform_11(%arg0: i32, %arg1: i32) -> (i32, i32, i32, i32) {
    %c1_i32 = arith.constant 1 : i32
    %0 = arith.subi %c1_i32, %arg0 : i32
    %1 = arith.muli %0, %arg1 : i32
    %c5_i32 = arith.constant 5 : i32
    %2 = arith.subi %c5_i32, %arg1 : i32
    %3 = arith.muli %arg0, %2 : i32
    %4 = arith.addi %1, %3 : i32
    %c0_i32 = arith.constant 0 : i32
    %c0_i32_0 = arith.constant 0 : i32
    %c0_i32_1 = arith.constant 0 : i32
    return %arg0, %4, %c0_i32, %c0_i32_0 : i32, i32, i32, i32
  }
  func.func @transform_12(%arg0: i32, %arg1: i32) -> (i32, i32, i32) {
    %c0_i32 = arith.constant 0 : i32
    %c0_i32_0 = arith.constant 0 : i32
    %c0_i32_1 = arith.constant 0 : i32
    return %arg0, %c0_i32, %c0_i32_0 : i32, i32, i32
  }
}

module attributes {stable_mosaic.version = 11 : i64} {
  func.func @_attn_kernel(%arg0: memref<2x6x16xbf16, #tpu.memory_space<vmem>>, %arg1: memref<2x8x32xbf16, #tpu.memory_space<vmem>>, %arg2: memref<2x1xi32, #tpu.memory_space<vmem>>, %arg3: memref<2x1xi32, #tpu.memory_space<vmem>>, %arg4: memref<32x16xbf16, #tpu.memory_space<vmem>>, %arg5: memref<32x16xbf16, #tpu.memory_space<vmem>>, %arg6: memref<16x16xbf16, #tpu.memory_space<vmem>>, %arg7: memref<1x16xf32, #tpu.memory_space<vmem>>, %arg8: memref<12x16xf32, #tpu.memory_space<vmem>>, %arg9: memref<2x6x8xf32, #tpu.memory_space<vmem>>) attributes {dimension_semantics = [], scalar_prefetch = 0 : i64, scratch_operands = 0 : i64, tpu.core_type = #tpu.core_type<tc>} {
    %c0 = arith.constant 0 : index
    %c0_0 = arith.constant 0 : index
    %c0_1 = arith.constant 0 : index
    %0 = vector.load %arg0[%c0, %c0_0, %c0_1] : memref<2x6x16xbf16, #tpu.memory_space<vmem>>, vector<2x6x16xbf16>
    %c0_2 = arith.constant 0 : index
    %c0_3 = arith.constant 0 : index
    %c0_4 = arith.constant 0 : index
    %1 = vector.load %arg1[%c0_2, %c0_3, %c0_4] : memref<2x8x32xbf16, #tpu.memory_space<vmem>>, vector<2x8x32xbf16>
    %2 = vector.shape_cast %1 : vector<2x8x32xbf16> to vector<16x32xbf16>
    %c0_5 = arith.constant 0 : index
    %c0_6 = arith.constant 0 : index
    %3 = vector.load %arg4[%c0_5, %c0_6] : memref<32x16xbf16, #tpu.memory_space<vmem>>, vector<32x16xbf16>
    %cst = arith.constant dense<0.000000e+00> : vector<16x16xf32>
    %4 = tpu.matmul %2, %3, %cst {dimension_numbers = #tpu.dot_dimension_numbers<[1], [0], [0], [1], [0, 0, 1, 1], [], []>} : vector<16x32xbf16>, vector<32x16xbf16>, vector<16x16xf32> -> vector<16x16xf32>
    %5 = vector.shape_cast %4 : vector<16x16xf32> to vector<2x8x16xf32>
    %6 = arith.truncf %5 : vector<2x8x16xf32> to vector<2x8x16xbf16>
    "tpu.trace_start"() <{level = 10 : i32, message = "btd,bsd->bts"}> : () -> ()
    %cst_7 = arith.constant dense<0.000000e+00> : vector<2x6x8xf32>
    %7 = tpu.matmul %0, %6, %cst_7 {dimension_numbers = #tpu.dot_dimension_numbers<[2], [2], [1], [1], [0, 0, 0, 1, 1, 1], [0], [0]>} : vector<2x6x16xbf16>, vector<2x8x16xbf16>, vector<2x6x8xf32> -> vector<2x6x8xf32>
    "tpu.trace_stop"() : () -> ()
    %8 = tpu.iota {dimensions = array<i32: 1>} : vector<2x6x8xi32>
    %9 = tpu.iota {dimensions = array<i32: 2>} : vector<2x6x8xi32>
    %c0_8 = arith.constant 0 : index
    %c0_9 = arith.constant 0 : index
    %10 = vector.load %arg3[%c0_8, %c0_9] : memref<2x1xi32, #tpu.memory_space<vmem>>, vector<2x1xi32>
    %11 = vector.shape_cast %10 : vector<2x1xi32> to vector<2x1x1xi32>
    %12 = vector.broadcast %11 : vector<2x1x1xi32> to vector<2x6x8xi32>
    %13 = arith.cmpi slt, %8, %12 : vector<2x6x8xi32>
    %c0_10 = arith.constant 0 : index
    %c0_11 = arith.constant 0 : index
    %14 = vector.load %arg2[%c0_10, %c0_11] : memref<2x1xi32, #tpu.memory_space<vmem>>, vector<2x1xi32>
    %15 = vector.shape_cast %14 : vector<2x1xi32> to vector<2x1x1xi32>
    %16 = vector.broadcast %15 : vector<2x1x1xi32> to vector<2x6x8xi32>
    %17 = arith.cmpi slt, %9, %16 : vector<2x6x8xi32>
    %18 = arith.andi %13, %17 : vector<2x6x8xi1>
    %cst_12 = arith.constant -1.000000e+06 : f32
    %19 = vector.broadcast %cst_12 : f32 to vector<2x6x8xf32>
    %20 = arith.select %18, %7, %19 : vector<2x6x8xi1>, vector<2x6x8xf32>
    %cst_13 = arith.constant dense<0xFF800000> : vector<2x6xf32>
    %21 = vector.multi_reduction <maximumf>, %20, %cst_13 [2] : vector<2x6x8xf32> to vector<2x6xf32>
    %22 = vector.shape_cast %21 : vector<2x6xf32> to vector<2x6x1xf32>
    %23 = vector.broadcast %22 : vector<2x6x1xf32> to vector<2x6x8xf32>
    %24 = arith.subf %20, %23 : vector<2x6x8xf32>
    %25 = math.exp %24 : vector<2x6x8xf32>
    %cst_14 = arith.constant dense<0.000000e+00> : vector<2x6xf32>
    %26 = vector.multi_reduction <add>, %25, %cst_14 [2] : vector<2x6x8xf32> to vector<2x6xf32>
    %27 = vector.shape_cast %26 : vector<2x6xf32> to vector<2x6x1xf32>
    %28 = vector.broadcast %27 : vector<2x6x1xf32> to vector<2x6x8xf32>
    %29 = arith.divf %25, %28 : vector<2x6x8xf32>
    %c0_15 = arith.constant 0 : index
    %c0_16 = arith.constant 0 : index
    %c0_17 = arith.constant 0 : index
    %30 = vector.load %arg9[%c0_15, %c0_16, %c0_17] : memref<2x6x8xf32, #tpu.memory_space<vmem>>, vector<2x6x8xf32>
    tpu.vector_store %arg9[%c0_15, %c0_16, %c0_17], %29 {strides = array<i32>} : memref<2x6x8xf32, #tpu.memory_space<vmem>>, vector<2x6x8xf32>,
    %31 = arith.truncf %29 : vector<2x6x8xf32> to vector<2x6x8xbf16>
    "tpu.trace_start"() <{level = 10 : i32, message = "bts,bsc->btc"}> : () -> ()
    %cst_18 = arith.constant dense<0.000000e+00> : vector<2x6x32xf32>
    %32 = tpu.matmul %31, %1, %cst_18 {dimension_numbers = #tpu.dot_dimension_numbers<[2], [1], [1], [2], [0, 0, 0, 1, 1, 2], [0], [0]>} : vector<2x6x8xbf16>, vector<2x8x32xbf16>, vector<2x6x32xf32> -> vector<2x6x32xf32>
    "tpu.trace_stop"() : () -> ()
    %33 = vector.shape_cast %32 : vector<2x6x32xf32> to vector<12x32xf32>
    %34 = arith.truncf %33 : vector<12x32xf32> to vector<12x32xbf16>
    %c0_19 = arith.constant 0 : index
    %c0_20 = arith.constant 0 : index
    %35 = vector.load %arg5[%c0_19, %c0_20] : memref<32x16xbf16, #tpu.memory_space<vmem>>, vector<32x16xbf16>
    %cst_21 = arith.constant dense<0.000000e+00> : vector<12x16xf32>
    %36 = tpu.matmul %34, %35, %cst_21 {dimension_numbers = #tpu.dot_dimension_numbers<[1], [0], [0], [1], [0, 0, 1, 1], [], []>} : vector<12x32xbf16>, vector<32x16xbf16>, vector<12x16xf32> -> vector<12x16xf32>
    %37 = vector.shape_cast %0 : vector<2x6x16xbf16> to vector<12x16xbf16>
    %c0_22 = arith.constant 0 : index
    %c0_23 = arith.constant 0 : index
    %38 = vector.load %arg6[%c0_22, %c0_23] : memref<16x16xbf16, #tpu.memory_space<vmem>>, vector<16x16xbf16>
    %cst_24 = arith.constant dense<0.000000e+00> : vector<12x16xf32>
    %39 = tpu.matmul %37, %38, %cst_24 {dimension_numbers = #tpu.dot_dimension_numbers<[1], [0], [0], [1], [0, 0, 1, 1], [], []>} : vector<12x16xbf16>, vector<16x16xbf16>, vector<12x16xf32> -> vector<12x16xf32>
    %40 = arith.addf %36, %39 : vector<12x16xf32>
    %c0_25 = arith.constant 0 : index
    %c0_26 = arith.constant 0 : index
    %41 = vector.load %arg7[%c0_25, %c0_26] : memref<1x16xf32, #tpu.memory_space<vmem>>, vector<1x16xf32>
    %42 = vector.broadcast %41 : vector<1x16xf32> to vector<12x16xf32>
    %43 = arith.addf %40, %42 : vector<12x16xf32>
    %44 = math.tanh %43 : vector<12x16xf32>
    %c0_27 = arith.constant 0 : index
    %c0_28 = arith.constant 0 : index
    %45 = vector.load %arg8[%c0_27, %c0_28] : memref<12x16xf32, #tpu.memory_space<vmem>>, vector<12x16xf32>
    tpu.vector_store %arg8[%c0_27, %c0_28], %44 {strides = array<i32>} : memref<12x16xf32, #tpu.memory_space<vmem>>, vector<12x16xf32>,
    return
  }
}

module attributes {stable_mosaic.version = 11 : i64} {
  func.func @_vocab_head_kernel(%arg0: i32, %arg1: memref<12x16xbf16, #tpu.memory_space<vmem>>, %arg2: memref<16x16xbf16, #tpu.memory_space<vmem>>, %arg3: memref<1x16xf32, #tpu.memory_space<vmem>>, %arg4: memref<12x16xf32, #tpu.memory_space<vmem>>, %arg5: memref<12x1xf32, #tpu.memory_space<vmem>>, %arg6: memref<12x1xf32, #tpu.memory_space<vmem>>, %arg7: memref<12x1xf32, #tpu.memory_space<vmem>>) attributes {dimension_semantics = [#tpu.dimension_semantics<arbitrary>], iteration_bounds = array<i64: 1>, scalar_prefetch = 0 : i64, scratch_operands = 2 : i64, tpu.core_type = #tpu.core_type<tc>, window_params = [{pipeline_mode = #tpu.pipeline_mode<synchronous>, transform_indices = @transform_0, window_bounds = array<i64: 12, 16>}, {transform_indices = @transform_1, window_bounds = array<i64: 16, 16>}, {transform_indices = @transform_2, window_bounds = array<i64: 1, 16>}, {transform_indices = @transform_3, window_bounds = array<i64: 12, 16>}, {pipeline_mode = #tpu.pipeline_mode<synchronous>, transform_indices = @transform_4, window_bounds = array<i64: 12, 1>}]} {
    %c0_i32 = arith.constant 0 : i32
    %0 = arith.cmpi eq, %arg0, %c0_i32 : i32
    %1 = arith.extui %0 : i1 to i32
    %c0_i32_0 = arith.constant 0 : i32
    %2 = arith.cmpi ne, %1, %c0_i32_0 : i32
    scf.if %2 {
      %cst_20 = arith.constant 0xFF800000 : f32
      %29 = vector.broadcast %cst_20 : f32 to vector<12x1xf32>
      %c0_21 = arith.constant 0 : index
      %c0_22 = arith.constant 0 : index
      %30 = vector.load %arg6[%c0_21, %c0_22] : memref<12x1xf32, #tpu.memory_space<vmem>>, vector<12x1xf32>
      tpu.vector_store %arg6[%c0_21, %c0_22], %29 {strides = array<i32>} : memref<12x1xf32, #tpu.memory_space<vmem>>, vector<12x1xf32>,
      %cst_23 = arith.constant 0.000000e+00 : f32
      %31 = vector.broadcast %cst_23 : f32 to vector<12x1xf32>
      %c0_24 = arith.constant 0 : index
      %c0_25 = arith.constant 0 : index
      %32 = vector.load %arg7[%c0_24, %c0_25] : memref<12x1xf32, #tpu.memory_space<vmem>>, vector<12x1xf32>
      tpu.vector_store %arg7[%c0_24, %c0_25], %31 {strides = array<i32>} : memref<12x1xf32, #tpu.memory_space<vmem>>, vector<12x1xf32>,
    } else {
    }
    %c0 = arith.constant 0 : index
    %c0_1 = arith.constant 0 : index
    %3 = vector.load %arg1[%c0, %c0_1] : memref<12x16xbf16, #tpu.memory_space<vmem>>, vector<12x16xbf16>
    %c0_2 = arith.constant 0 : index
    %c0_3 = arith.constant 0 : index
    %4 = vector.load %arg2[%c0_2, %c0_3] : memref<16x16xbf16, #tpu.memory_space<vmem>>, vector<16x16xbf16>
    %cst = arith.constant dense<0.000000e+00> : vector<12x16xf32>
    %5 = tpu.matmul %3, %4, %cst {dimension_numbers = #tpu.dot_dimension_numbers<[1], [0], [0], [1], [0, 0, 1, 1], [], []>} : vector<12x16xbf16>, vector<16x16xbf16>, vector<12x16xf32> -> vector<12x16xf32>
    %c0_4 = arith.constant 0 : index
    %c0_5 = arith.constant 0 : index
    %6 = vector.load %arg3[%c0_4, %c0_5] : memref<1x16xf32, #tpu.memory_space<vmem>>, vector<1x16xf32>
    %7 = vector.broadcast %6 : vector<1x16xf32> to vector<12x16xf32>
    %8 = arith.addf %5, %7 : vector<12x16xf32>
    %c0_6 = arith.constant 0 : index
    %c0_7 = arith.constant 0 : index
    %9 = vector.load %arg4[%c0_6, %c0_7] : memref<12x16xf32, #tpu.memory_space<vmem>>, vector<12x16xf32>
    tpu.vector_store %arg4[%c0_6, %c0_7], %8 {strides = array<i32>} : memref<12x16xf32, #tpu.memory_space<vmem>>, vector<12x16xf32>,
    %c0_8 = arith.constant 0 : index
    %c0_9 = arith.constant 0 : index
    %10 = vector.load %arg6[%c0_8, %c0_9] : memref<12x1xf32, #tpu.memory_space<vmem>>, vector<12x1xf32>
    %cst_10 = arith.constant dense<0xFF800000> : vector<12xf32>
    %11 = vector.multi_reduction <maximumf>, %8, %cst_10 [1] : vector<12x16xf32> to vector<12xf32>
    %12 = vector.shape_cast %11 : vector<12xf32> to vector<12x1xf32>
    %13 = arith.maximumf %10, %12 : vector<12x1xf32>
    %c0_11 = arith.constant 0 : index
    %c0_12 = arith.constant 0 : index
    %14 = vector.load %arg7[%c0_11, %c0_12] : memref<12x1xf32, #tpu.memory_space<vmem>>, vector<12x1xf32>
    %15 = arith.subf %10, %13 : vector<12x1xf32>
    %16 = math.exp %15 : vector<12x1xf32>
    %17 = arith.mulf %14, %16 : vector<12x1xf32>
    %18 = vector.broadcast %13 : vector<12x1xf32> to vector<12x16xf32>
    %19 = arith.subf %8, %18 : vector<12x16xf32>
    %20 = math.exp %19 : vector<12x16xf32>
    %cst_13 = arith.constant dense<0.000000e+00> : vector<12xf32>
    %21 = vector.multi_reduction <add>, %20, %cst_13 [1] : vector<12x16xf32> to vector<12xf32>
    %22 = vector.shape_cast %21 : vector<12xf32> to vector<12x1xf32>
    %23 = arith.addf %17, %22 : vector<12x1xf32>
    %c0_14 = arith.constant 0 : index
    %c0_15 = arith.constant 0 : index
    %24 = vector.load %arg7[%c0_14, %c0_15] : memref<12x1xf32, #tpu.memory_space<vmem>>, vector<12x1xf32>
    tpu.vector_store %arg7[%c0_14, %c0_15], %23 {strides = array<i32>} : memref<12x1xf32, #tpu.memory_space<vmem>>, vector<12x1xf32>,
    %c0_16 = arith.constant 0 : index
    %c0_17 = arith.constant 0 : index
    %25 = vector.load %arg6[%c0_16, %c0_17] : memref<12x1xf32, #tpu.memory_space<vmem>>, vector<12x1xf32>
    tpu.vector_store %arg6[%c0_16, %c0_17], %13 {strides = array<i32>} : memref<12x1xf32, #tpu.memory_space<vmem>>, vector<12x1xf32>,
    %c0_i32_18 = arith.constant 0 : i32
    %26 = arith.cmpi eq, %arg0, %c0_i32_18 : i32
    %27 = arith.extui %26 : i1 to i32
    %c0_i32_19 = arith.constant 0 : i32
    %28 = arith.cmpi ne, %27, %c0_i32_19 : i32
    scf.if %28 {
      %c0_20 = arith.constant 0 : index
      %c0_21 = arith.constant 0 : index
      %29 = vector.load %arg6[%c0_20, %c0_21] : memref<12x1xf32, #tpu.memory_space<vmem>>, vector<12x1xf32>
      %c0_22 = arith.constant 0 : index
      %c0_23 = arith.constant 0 : index
      %30 = vector.load %arg7[%c0_22, %c0_23] : memref<12x1xf32, #tpu.memory_space<vmem>>, vector<12x1xf32>
      %31 = math.log %30 : vector<12x1xf32>
      %32 = arith.addf %29, %31 : vector<12x1xf32>
      %c0_24 = arith.constant 0 : index
      %c0_25 = arith.constant 0 : index
      %33 = vector.load %arg5[%c0_24, %c0_25] : memref<12x1xf32, #tpu.memory_space<vmem>>, vector<12x1xf32>
      tpu.vector_store %arg5[%c0_24, %c0_25], %32 {strides = array<i32>} : memref<12x1xf32, #tpu.memory_space<vmem>>, vector<12x1xf32>,
    } else {
    }
    return
  }
  func.func @transform_0(%arg0: i32) -> (i32, i32) {
    %c0_i32 = arith.constant 0 : i32
    %c0_i32_0 = arith.constant 0 : i32
    %c0_i32_1 = arith.constant 0 : i32
    return %c0_i32, %c0_i32_0 : i32, i32
  }
  func.func @transform_1(%arg0: i32) -> (i32, i32) {
    %c0_i32 = arith.constant 0 : i32
    %c0_i32_0 = arith.constant 0 : i32
    return %c0_i32, %arg0 : i32, i32
  }
  func.func @transform_2(%arg0: i32) -> (i32, i32) {
    %c0_i32 = arith.constant 0 : i32
    %c0_i32_0 = arith.constant 0 : i32
    return %c0_i32, %arg0 : i32, i32
  }
  func.func @transform_3(%arg0: i32) -> (i32, i32) {
    %c0_i32 = arith.constant 0 : i32
    %c0_i32_0 = arith.constant 0 : i32
    return %c0_i32, %arg0 : i32, i32
  }
  func.func @transform_4(%arg0: i32) -> (i32, i32) {
    %c0_i32 = arith.constant 0 : i32
    %c0_i32_0 = arith.constant 0 : i32
    %c0_i32_1 = arith.constant 0 : i32
    return %c0_i32, %c0_i32_0 : i32, i32
  }
}

module attributes {stable_mosaic.version = 11 : i64} {
  func.func @_sub_lse_kernel(%arg0: i32, %arg1: memref<12x16xf32, #tpu.memory_space<vmem>>, %arg2: memref<12x1xf32, #tpu.memory_space<vmem>>, %arg3: memref<12x16xf32, #tpu.memory_space<vmem>>) attributes {dimension_semantics = [#tpu.dimension_semantics<parallel>], iteration_bounds = array<i64: 1>, scalar_prefetch = 0 : i64, scratch_operands = 0 : i64, tpu.core_type = #tpu.core_type<tc>, window_params = [{transform_indices = @transform_0, window_bounds = array<i64: 12, 16>}, {pipeline_mode = #tpu.pipeline_mode<synchronous>, transform_indices = @transform_1, window_bounds = array<i64: 12, 1>}, {transform_indices = @transform_2, window_bounds = array<i64: 12, 16>}]} {
    %c0 = arith.constant 0 : index
    %c0_0 = arith.constant 0 : index
    %0 = vector.load %arg1[%c0, %c0_0] : memref<12x16xf32, #tpu.memory_space<vmem>>, vector<12x16xf32>
    %c0_1 = arith.constant 0 : index
    %c0_2 = arith.constant 0 : index
    %1 = vector.load %arg2[%c0_1, %c0_2] : memref<12x1xf32, #tpu.memory_space<vmem>>, vector<12x1xf32>
    %2 = vector.broadcast %1 : vector<12x1xf32> to vector<12x16xf32>
    %3 = arith.subf %0, %2 : vector<12x16xf32>
    %c0_3 = arith.constant 0 : index
    %c0_4 = arith.constant 0 : index
    %4 = vector.load %arg3[%c0_3, %c0_4] : memref<12x16xf32, #tpu.memory_space<vmem>>, vector<12x16xf32>
    tpu.vector_store %arg3[%c0_3, %c0_4], %3 {strides = array<i32>} : memref<12x16xf32, #tpu.memory_space<vmem>>, vector<12x16xf32>,
    return
  }
  func.func @transform_0(%arg0: i32) -> (i32, i32) {
    %c0_i32 = arith.constant 0 : i32
    %c0_i32_0 = arith.constant 0 : i32
    return %c0_i32, %arg0 : i32, i32
  }
  func.func @transform_1(%arg0: i32) -> (i32, i32) {
    %c0_i32 = arith.constant 0 : i32
    %c0_i32_0 = arith.constant 0 : i32
    %c0_i32_1 = arith.constant 0 : i32
    return %c0_i32, %c0_i32_0 : i32, i32
  }
  func.func @transform_2(%arg0: i32) -> (i32, i32) {
    %c0_i32 = arith.constant 0 : i32
    %c0_i32_0 = arith.constant 0 : i32
    return %c0_i32, %arg0 : i32, i32
  }
}

</mosaic_0001>

<bundles_post_ra>
// kernel: seq2seq_forward.8
= control target key start
LH: loop header
LB: loop body
LE: loop exit
PB: predicated region body
PF: predicated region fallthrough
CT: control target
= control target key end

     0   :  { %s900_s30 = smov 0   ;;  %s957_s0 = inlined_call_operand.vmem [shape: bf16[16,8], index: 0, kind: input, shape index: {}]   ;;  %s958_s1 = inlined_call_operand.vmem [shape: bf16[2,8,16], index: 1, kind: input, shape index: {}]   ;;  %s959_s2 = inlined_call_operand.vmem [shape: bf16[2,8,16], index: 2, kind: input, shape index: {}]   ;;  %s960_s3 = inlined_call_operand.vmem [shape: bf16[2,8,16], index: 3, kind: input, shape index: {}]   ;;  %s961_s4 = inlined_call_operand.vmem [shape: f32[2,1,16], index: 4, kind: input, shape index: {}]   ;;  %s962_s5 = inlined_call_operand.vmem [shape: f32[2,1,16], index: 5, kind: input, shape index: {}]   ;;  %s963_s6 = inlined_call_operand.vmem [shape: f32[2,1,16], index: 6, kind: input, shape index: {}]   ;;  %s964_s7 = inlined_call_operand.vmem [shape: f32[2,16,16], index: 7, kind: output, shape index: {0}]   ;;  %s965_s8 = inlined_call_operand.vmem [shape: f32[2,16,16], index: 8, kind: output, shape index: {1}]   ;;  %s966_s9 = inlined_call_operand.vmem [shape: f32[2,16,16], index: 9, kind: output, shape index: {2}]  }
   0x1 LB: > { %s779_s10 = sadd.s32 4294967295, %s846_s30   ;;  %p783_p0 = scmp.ge.s32.totalorder %s846_s30, 1  ;;  %s846_s30 = sphi %s900_s30, %s20_s30  }
   0x2   : > { %p333_p1 = scmp.lt.s32.totalorder %s846_s30, 3 }
   0x4   : > { %p334_p2 = pnand %p783_p0, %p333_p1 }
   0x5   : > { %p395_p3 = scmp.lt.s32.totalorder (!%p334_p2), %s779_s10, 1  ;;  %v848_v0 = vmov (!%p334_p2), 0.0   ;;  %vm849_vm0 = vmmov (!%p334_p2), 0   ;;  %vm451_vm1 = vcmask (!%p334_p2), 1043456   ;;  %v839_v4 = vld [vmem:[%s957_s0] sm:$0xff] (!%p334_p2)   ;;  %vm447_vm2 = vcmask (!%p334_p2), 64512  }
   0x6   : > { %337 = sbr.rel (%p334_p2) target bundleno = 246 (0xf6), region = 48  ;;  %811 = vmatprep.subr.bf16.mxu0 (!%p334_p2), %v848_v0  ;;  %813 = vmatprep.mubr.msk.bf16.mxu0 (!%p334_p2), %vm849_vm0, %v848_v0  ;;  %vm496_vm3 = vcmask (!%p334_p2), 130048  }
   0x7   : > { %817 = vmatprep.subr.bf16.mxu1 (!%p334_p2), %v848_v0  ;;  %819 = vmatprep.mubr.msk.bf16.mxu1 (!%p334_p2), %vm849_vm0, %v848_v0 }
   0xd   : > { %s968_s10 = smov (!%p395_p3, %s779_s10), 1 }
   0xe   : > { %s784_s11 = sshll.u32 %s968_s10, 2  ;;  %s409_s25 = scalar_lea.vmem %s961_s4, %s968_s10 }
   0xf   : > { %s398_s14 = scalar_lea.vmem %s958_s1, %s784_s11  ;;  %s406_s17 = scalar_lea.vmem %s960_s3, %s784_s11  ;;  %v793_v8 = vld [vmem:[%s409_s25] ss:$0 sm:$0xff] }
  0x10   : > { %v434_v1 = vld [vmem:[%s398_s14] sm:$0xf]  ;;  %s402_s20 = scalar_lea.vmem %s959_s2, %s784_s11  ;;  %s412_s28 = scalar_lea.vmem %s962_s5, %s968_s10 }
  0x11   : > { %v553_v2 = vld [vmem:[%s406_s17] sm:$0xf]  ;;  %v453_v3 = vsel %vm451_vm1, %v434_v1, 0  ;;  %s802_s29 = sshll.u32 %s968_s10, 4  ;;  %s415_s19 = scalar_lea.vmem %s963_s6, %s968_s10 }
  0x12   : > { %v499_v5 = vld [vmem:[%s402_s20] sm:$0xf]  ;;  %812 = vmatpush3.bf16.msra.mxu0 %v453_v3  ;;  %v562_v7 = vsel %vm451_vm1, %v553_v2, 0  ;;  %s420_s13 = scalar_lea.vmem %s964_s7, %s802_s29  ;;  %s425_s16 = scalar_lea.vmem %s965_s8, %s802_s29 }
  0x13   : > { %v508_v6 = vsel %vm451_vm1, %v499_v5, 0  ;;  %823 = vmatprep.subr.bf16.mxu0 %v848_v0  ;;  %v796_v9 = vld [vmem:[%s412_s28] ss:$0 sm:$0xff]  ;;  %s430_s22 = scalar_lea.vmem %s966_s9, %s802_s29 }
  0x14   : > { %818 = vmatpush3.bf16.msra.mxu1 %v508_v6  ;;  %v798_v22 = vld [vmem:[%s415_s19] ss:$0 sm:$0xff] }
  0x15   : > { %814 = vmatmul.mubr.msk.bf16.vlgmr.msra.gmra.mrb[0].mxu0 %vm447_vm2, %v839_v4 }
  0x16   : > { %824 = vmatpush3.bf16.msra.mxu0 %v562_v7  ;;  %825 = vmatprep.mubr.msk.bf16.mxu0 %vm849_vm0, %v848_v0 }
  0x17   : > { %820 = vmatmul.mubr.msk.bf16.vlgmr.msra.gmra.mrb[0].mxu1 %vm447_vm2, %v839_v4 }
  0x1d   : > { %826 = vmatmul.mubr.msk.bf16.vlgmr.msra.gmra.mrb[4].mxu0 %vm447_vm2, %v839_v4 }
  0xe8   : > { %v489_v10 = vpop.f32.mrb[0].mxu0 }
  0xe9   : > { %v490_v11 = vadd.f32 %v793_v8, %v489_v10  ;;  %v815_v12 = vpop.f32.mrb[1].mxu0 }
  0xea   : > { %v544_v13 = vpop.f32.mrb[0].mxu1  ;;  %v492_v14 = vpop.f32.mrb[2].mxu0 }
  0xeb   : > { %v545_v15 = vadd.f32 %v796_v9, %v544_v13  ;;  %v821_v16 = vpop.f32.mrb[1].mxu1  ;;  %497 = vst.msk [vmem:[%s420_s13] sm:$0xff] %vm496_vm3, %v490_v11  ;;  %v493_v17 = vadd.f32 %v793_v8, %v492_v14  ;;  %v816_v18 = vpop.f32.mrb[3].mxu0 }
  0xec   : > { %v547_v19 = vpop.f32.mrb[2].mxu1 }
  0xed   : > { %551 = vst.msk [vmem:[%s425_s16] sm:$0xff] %vm496_vm3, %v545_v15  ;;  %v548_v20 = vadd.f32 %v796_v9, %v547_v19  ;;  %v822_v21 = vpop.f32.mrb[3].mxu1  ;;  %498 = vst.msk [vmem:[%s420_s13 + $0x8] sm:$0xff] %vm496_vm3, %v493_v17 }
  0xef   : > { %552 = vst.msk [vmem:[%s425_s16 + $0x8] sm:$0xff] %vm496_vm3, %v548_v20 }
  0xf0   : > { %v598_v23 = vpop.f32.mrb[4].mxu0 }
  0xf1   : > { %v599_v24 = vadd.f32 %v798_v22, %v598_v23  ;;  %v827_v25 = vpop.f32.mrb[5].mxu0 }
  0xf2   : > { %v601_v26 = vpop.f32.mrb[6].mxu0 }
  0xf3   : > { %605 = vst.msk [vmem:[%s430_s22] sm:$0xff] %vm496_vm3, %v599_v24  ;;  %v602_v27 = vadd.f32 %v798_v22, %v601_v26  ;;  %v828_v28 = vpop.f32.mrb[7].mxu0 }
  0xf5   : > { %606 = vst.msk [vmem:[%s430_s22 + $0x8] sm:$0xff] %vm496_vm3, %v602_v27 }
  0xf6 PF: > { %s20_s30 = sadd.s32 1, %s846_s30  }
  0xf7   : > { %p17_p4 = scmp.ge.s32.totalorder %s20_s30, 4  }
  0xf9   :  { %19 = sbr.rel (!%p17_p4) target bundleno = 1 (0x1), region = 117 }

// kernel: seq2seq_forward.10
= control target key start
LH: loop header
LB: loop body
LE: loop exit
PB: predicated region body
PF: predicated region fallthrough
CT: control target
= control target key end

     0   :  { %v168_v0 = vmov 0.0   ;;  %vm169_vm0 = vmmov 0   ;;  %vm33_vm1 = vcmask 130048   ;;  %vm135_vm2 = vcmask 123904   ;;  %s218_s3 = inlined_call_operand.vmem [shape: bf16[16,16], index: 3, kind: input, shape index: {}]   ;;  %s219_s2 = inlined_call_operand.vmem [shape: bf16[16,16], index: 2, kind: input, shape index: {}]   ;;  %s220_s1 = inlined_call_operand.vmem [shape: bf16[2,16], index: 1, kind: input, shape index: {}]   ;;  %s221_s0 = inlined_call_operand.vmem [shape: bf16[2,16], index: 0, kind: input, shape index: {}]   ;;  %s222_s4 = inlined_call_operand.vmem [shape: f32[1,16], index: 4, kind: input, shape index: {}]   ;;  %s223_s5 = inlined_call_operand.vmem [shape: f32[2,16], index: 5, kind: output, shape index: {}]  }
   0x1   :  { %150 = vmatprep.subr.bf16.mxu0 %v168_v0  ;;  %156 = vmatprep.subr.bf16.mxu1 %v168_v0  ;;  %v164_v1 = vld [vmem:[%s218_s3] sm:$0xff]  }
   0x2   :  { %v165_v2 = vld [vmem:[%s219_s2] sm:$0xff]   ;;  %152 = vmatprep.mubr.msk.bf16.mxu0 %vm169_vm0, %v168_v0  ;;  %158 = vmatprep.mubr.msk.bf16.mxu1 %vm169_vm0, %v168_v0 }
   0x3   :  { %151 = vmatpush3.bf16.msra.mxu0 %v164_v1  ;;  %v24_v3 = vld [vmem:[%s220_s1] sm:$0x1]  ;;  %157 = vmatpush3.bf16.msra.mxu1 %v165_v2 }
   0x4   :  { %v21_v4 = vld [vmem:[%s221_s0] sm:$0x1] }
   0x5   :  { %v145_v7 = vld [vmem:[%s222_s4] ss:$0 sm:$0xff] }
   0x6   :  { %153 = vmatmul.mubr.msk.bf16.vlgmr.msra.gmra.mrb[0].mxu0 %vm33_vm1, %v24_v3  ;;  %159 = vmatmul.mubr.msk.bf16.vlgmr.msra.gmra.mrb[0].mxu1 %vm33_vm1, %v21_v4 }
  0xd9   :  { %v71_v5 = vpop.f32.mrb[0].mxu0  ;;  %v120_v6 = vpop.f32.mrb[0].mxu1 }
  0xda   :  { %v154_v8 = vpop.f32.mrb[1].mxu0  ;;  %v121_v9 = vadd.f32 %v120_v6, %v71_v5  ;;  %v160_v10 = vpop.f32.mrb[1].mxu1 }
  0xdb   :  { %v74_v11 = vpop.f32.mrb[2].mxu0  ;;  %v123_v12 = vpop.f32.mrb[2].mxu1 }
  0xdc   :  { %v155_v13 = vpop.f32.mrb[3].mxu0  ;;  %v133_v14 = vadd.f32 %v145_v7, %v121_v9  ;;  %v161_v15 = vpop.f32.mrb[3].mxu1 }
  0xde   :  { %166 = vtanh.f32 %v133_v14 }
  0xe8   :  { %v167_v16 = vpop.eup %166 }
  0xe9   :  { %136 = vst.msk [vmem:[%s223_s5] sm:$0x3] %vm135_vm2, %v167_v16 }

// kernel: seq2seq_forward.9
= control target key start
LH: loop header
LB: loop body
LE: loop exit
PB: predicated region body
PF: predicated region fallthrough
CT: control target
= control target key end

     0   :  { %s1458_s21 = smov 0   ;;  %s1460_s22 = smov 0   ;;  %s1622_s0 = inlined_call_operand.vmem [shape: f32[2,8,2,16], index: 0, kind: input, shape index: {}]   ;;  %s1623_s1 = inlined_call_operand.vmem [shape: f32[2,8,2,16], index: 1, kind: input, shape index: {}]   ;;  %s1624_s2 = inlined_call_operand.vmem [shape: f32[2,8,2,16], index: 2, kind: input, shape index: {}]   ;;  %s1625_s3 = inlined_call_operand.vmem [shape: s32[2,1], index: 3, kind: input, shape index: {}]   ;;  %s1626_s4 = inlined_call_operand.vmem [shape: f32[2,2,16], index: 4, kind: input, shape index: {}]   ;;  %s1627_s5 = inlined_call_operand.vmem [shape: bf16[2,16,16], index: 5, kind: input, shape index: {}]   ;;  %s1628_s6 = inlined_call_operand.vmem [shape: bf16[2,16,16], index: 6, kind: input, shape index: {}]   ;;  %s1629_s7 = inlined_call_operand.vmem [shape: bf16[2,16,16], index: 7, kind: input, shape index: {}]   ;;  %s1630_s8 = inlined_call_operand.vmem [shape: f32[2,1,16], index: 8, kind: input, shape index: {}]   ;;  %s1631_s9 = inlined_call_operand.vmem [shape: f32[2,1,16], index: 9, kind: input, shape index: {}]   ;;  %s1632_s10 = inlined_call_operand.vmem [shape: f32[2,1,16], index: 10, kind: input, shape index: {}]   ;;  %s1633_s11 = inlined_call_operand.vmem [shape: bf16[2,8,2,16], index: 11, kind: output, shape index: {0}]   ;;  %s1634_s12 = inlined_call_operand.vmem [shape: f32[2,2,16], index: 12, kind: output, shape index: {1}]  }
   0x1   :  { %1640 = sst [smem:[#allocation10_spill]] %s1625_s3  ;;  %s1462_s23 = smov 0  }
   0x2   :  { %1641 = sst [smem:[#allocation11_spill]] %s1626_s4  ;;  %s1464_s24 = smov 0  }
   0x3   :  { %1642 = sst [smem:[#allocation12_spill]] %s1627_s5  ;;  %s1466_s25 = smov 0  }
   0x4   :  { %1643 = sst [smem:[#allocation13_spill]] %s1628_s6 }
   0x5   :  { %1644 = sst [smem:[#allocation14_spill]] %s1629_s7 }
   0x6   :  { %1645 = sst [smem:[#allocation15_spill]] %s1630_s8 }
   0x7   :  { %1646 = sst [smem:[#allocation16_spill]] %s1634_s12 }
   0x8 LB: > { %1647 = sst [smem:[#allocation3_spill]] %s1372_s21  ;;  %s32_s26 = sadd.s32 1, %s1380_s23  ;;  %s1388_s25 = sphi %s1466_s25, %s23_s25   ;;  %s1384_s24 = sphi %s1464_s24, %s1672_s24   ;;  %s1380_s23 = sphi %s1462_s23, %s1671_s23   ;;  %s1376_s22 = sphi %s1460_s22, %s1670_s22   ;;  %s1372_s21 = sphi %s1458_s21, %s1669_s21  }
   0x9   : > { %1648 = sst [smem:[#allocation4_spill]] %s1380_s23  ;;  %s35_s27 = sadd.s32 1, %s1384_s24 }
   0xa   : > { %1649 = sst [smem:[#allocation5_spill]] %s1384_s24  ;;  %p33_p0 = scmp.ge.s32.totalorder %s32_s26, 8 }
   0xb   : > { %1650 = sst [smem:[#allocation6_spill]] %s1388_s25  ;;  %p1235_p1 = scmp.ge.s32.totalorder %s1388_s25, 1 }
   0xc   : > { %p547_p2 = scmp.lt.s32.totalorder %s1388_s25, 17  ;;  %s1674_s26 = smov (%p33_p0, %s32_s26), 0 }
   0xd   : > { %1651 = sst [smem:[#allocation7_spill]] %s1674_s26  ;;  %s1676_s27 = smov (!%p33_p0, %s35_s27), %s1384_s24 }
   0xe   : > { %p548_p3 = pnand %p1235_p1, %p547_p2  ;;  %p37_p4 = scmp.ge.s32.totalorder %s1676_s27, 2 }
  0x10   : > { %s1678_s27 = smov (%p37_p4, %s1676_s27), 0  ;;  %551 = sbr.rel (%p548_p3) target bundleno = 321 (0x141), region = 64 }
  0x11   : > { %1652 = sst [smem:[#allocation8_spill]] %s1678_s27 }
  0x17   : > { %s662_s28 = ssub.s32 1, %s1376_s22  ;;  %s664_s29 = ssub.s32 7, %s1372_s21 }
  0x18   : > { %s663_s30 = smul.u32 %s1372_s21, %s662_s28  ;;  %p667_p5 = scmp.lt.s32.totalorder %s1376_s22, 1 }
  0x19   : > { %s665_s13 = smul.u32 %s1376_s22, %s664_s29  ;;  %s1654_s5 = sld [smem:[#allocation12_spill]] }
  0x1a   : > { %s1680_s22 = smov (!%p667_p5, %s1376_s22), 1  ;;  %s1655_s4 = sld [smem:[#allocation11_spill]] }
  0x1b   : > { %s1494_s14 = sadd.s32 %s665_s13, %s663_s30  ;;  %s1498_s15 = sshll.u32 %s1680_s22, 3 }
  0x1c   : > { %1653 = sst [smem:[#allocation9_spill]] %s1494_s14  ;;  %p669_p6 = scmp.lt.s32.totalorder %s1494_s14, 7 }
  0x1d   : > { %s1242_s16 = sshll.u32 %s1680_s22, 1  ;;  %s1656_s6 = sld [smem:[#allocation13_spill]] }
  0x1e   : > { %s670_s20 = scalar_select %p669_p6, %s1494_s14, 7 }
  0x1f   : > { %s724_s19 = scalar_lea.vmem %s1654_s5, %s1498_s15  ;;  %s1657_s7 = sld [smem:[#allocation14_spill]] }
  0x20   : > { %s719_s30 = scalar_lea.vmem %s1655_s4, %s1242_s16  ;;  %s1514_s24 = sadd.s32 %s1498_s15, %s670_s20 }
  0x21   : > { %s1521_s21 = sshll.u32 %s1514_s24, 1  ;;  %s740_s17 = scalar_lea.vmem %s1631_s9, %s1680_s22 }
  0x22   : > { %s743_s28 = scalar_lea.vmem %s1632_s10, %s1680_s22  ;;  %s755_s29 = scalar_lea.vmem %s1633_s11, %s1514_s24 }
  0x23   : > { %s729_s26 = scalar_lea.vmem %s1656_s6, %s1498_s15  ;;  %s1659_s4 = sld [smem:[#allocation16_spill]] }
  0x24   : > { %s1660_s23 = sld [smem:[#allocation3_spill]] }
  0x25   : > { %s734_s3 = scalar_lea.vmem %s1657_s7, %s1498_s15  ;;  %s710_s15 = scalar_lea.vmem %s1624_s2, %s1521_s21 }
  0x29   : > { %s1554_s13 = scalar_lea.vmem %s1659_s4, %s1242_s16 }
  0x2a   : > { %p1251_p7 = scmp.ne.s32.totalorder %s1660_s23, 0 }
  0x2b   : > { %v775_v0 = vld [vmem:[%s719_s30] sm:$0x3] (!%p1251_p7)  ;;  %vm776_vm0 = vcmask (!%p1251_p7), 123904  }
  0x2c   : > { %774 = sbr.rel (%p1251_p7) target bundleno = 51 (0x33), region = 68  ;;  %777 = vst.msk [vmem:[#allocation2] sm:$0x3] (!%p1251_p7), %vm776_vm0, %v775_v0 }
  0x33 PF: > { %v1337_v1 = vld [vmem:[%s724_s19] sm:$0xff]   ;;  %s1661_s5 = sld [smem:[#allocation9_spill]]  ;;  %v1390_v2 = vmov 0.0   ;;  %vm795_vm1 = vcmask 130048   ;;  %vm1391_vm2 = vmmov 0   ;;  %v1392_v9 = vmov 0   ;;  %s1665_s30 = scalar_lea.vmem %s1622_s0, %s1521_s21 }
  0x34   : > { %1275 = vmatprep.subr.bf16.mxu0 %v1390_v2  ;;  %v1557_v3 = vld [vmem:[#allocation2] sm:$0x3]  ;;  %1281 = vmatprep.subr.bf16.mxu1 %v1390_v2  ;;  %s1662_s8 = sld [smem:[#allocation10_spill]]  ;;  %s1666_s27 = scalar_lea.vmem %s1623_s1, %s1521_s21  ;;  %vm982_vm5 = vcmask 123904   ;;  %vm986_vm6 = vcmask 122880  }
  0x35   : > { %1276 = vmatpush3.bf16.msra.mxu0 %v1337_v1  ;;  %1277 = vmatprep.mubr.msk.bf16.mxu0 %vm1391_vm2, %v1390_v2  ;;  %v779_v5 = vpack.c.bf16 %v1557_v3, %v1557_v3  ;;  %v1338_v6 = vld [vmem:[%s729_s26] sm:$0xff]   ;;  %s1663_s26 = sld [smem:[#allocation15_spill]] }
  0x36   : > { %1283 = vmatprep.mubr.msk.bf16.mxu1 %vm1391_vm2, %v1390_v2  ;;  %1287 = vmatprep.subr.bf16.mxu0 %v1390_v2  ;;  %v1339_v7 = vld [vmem:[%s734_s3] sm:$0xff]  }
  0x37   : > { %1282 = vmatpush3.bf16.msra.mxu1 %v1338_v6  ;;  %1336 = vset.pattern.permute.xlu0 %v1392_v9  ;;  %v949_v13 = vld [vmem:[%s1665_s30] sm:$0x3] }
  0x38   : > { %1278 = vmatmul.mubr.msk.bf16.vlgmr.msra.gmra.mrb[0].mxu0 %vm795_vm1, %v779_v5  ;;  %v1255_v14 = vld [vmem:[%s740_s17] ss:$0 sm:$0xff] }
  0x39   : > { %v974_v4 = vstv %s1661_s5  ;;  %1288 = vmatpush3.bf16.msra.mxu0 %v1339_v7  ;;  %1289 = vmatprep.mubr.msk.bf16.mxu0 %vm1391_vm2, %v1390_v2  ;;  %v957_v19 = vld [vmem:[%s1666_s27] sm:$0x3] }
  0x3a   : > { %v973_v8 = vld [vmem:[%s1662_s8] sm:$0x3]  ;;  %1284 = vmatmul.mubr.msk.bf16.vlgmr.msra.gmra.mrb[0].mxu1 %vm795_vm1, %v779_v5 }
  0x3b   : > { %vm975_vm3 = vcmp.lt.s32.totalorder %v974_v4, %v973_v8  ;;  %s1664_s14 = scalar_lea.vmem %s1663_s26, %s1680_s22  ;;  %v1258_v36 = vld [vmem:[%s743_s28] ss:$0 sm:$0xff]  ;;  %s1667_s28 = sld [smem:[#allocation3_spill]] }
  0x3c   : > { %v976_v10 = vsel %vm975_vm3, 1, %v1392_v9  ;;  %v1252_v11 = vld [vmem:[%s1664_s14] ss:$0 sm:$0xff] }
  0x3d   : > { %978 = vperm.xlu0 %1336, %v976_v10   ;;  %v965_v40 = vld [vmem:[%s710_s15] sm:$0x3] }
  0x40   : > { %1290 = vmatmul.mubr.msk.bf16.vlgmr.msra.gmra.mrb[4].mxu0 %vm795_vm1, %v779_v5 }
  0x41   : > { %p1263_p8 = scmp.ne.s32.totalorder %s1667_s28, 7 }
  0xbc   : > { %v979_v45 = vpop.permute.xlu0 %978 }
  0xbd   : > { %vm980_vm4 = vcmp.eq.s32.totalorder %v979_v45, 1 }
 0x10b   : > { %v833_v12 = vpop.f32.mrb[0].mxu0 }
 0x10c   : > { %v834_v15 = vadd.f32 %v1252_v11, %v833_v12  ;;  %v1279_v16 = vpop.f32.mrb[1].mxu0 }
 0x10d   : > { %v836_v17 = vpop.f32.mrb[2].mxu0  ;;  %v888_v18 = vpop.f32.mrb[0].mxu1 }
 0x10e   : > { %v950_v20 = vadd.f32 %v949_v13, %v834_v15  ;;  %v1280_v21 = vpop.f32.mrb[3].mxu0  ;;  %v889_v22 = vadd.f32 %v1255_v14, %v888_v18  ;;  %v1285_v23 = vpop.f32.mrb[1].mxu1 }
 0x10f   : > { %v891_v24 = vpop.f32.mrb[2].mxu1 }
 0x110   : > { %v1261_v25 = vmul.f32 -1.442695, %v950_v20  ;;  %v958_v26 = vadd.f32 %v957_v19, %v889_v22  ;;  %v1286_v27 = vpop.f32.mrb[3].mxu1 }
 0x112   : > { %1340 = vpow2.f32 %v1261_v25  ;;  %v1262_v28 = vmul.f32 -1.442695, %v958_v26 }
 0x113   : > { %v943_v29 = vpop.f32.mrb[4].mxu0 }
 0x114   : > { %v1291_v30 = vpop.f32.mrb[5].mxu0  ;;  %1342 = vpow2.f32 %v1262_v28  ;;  %v944_v38 = vadd.f32 %v1258_v36, %v943_v29 }
 0x115   : > { %v946_v31 = vpop.f32.mrb[6].mxu0 }
 0x116   : > { %v1292_v32 = vpop.f32.mrb[7].mxu0 }
 0x11c   : > { %v1341_v33 = vpop.eup %1340 }
 0x11d   : > { %v954_v34 = vadd.f32 1.0, %v1341_v33 }
 0x11e   : > { %v1343_v35 = vpop.eup %1342 }
 0x11f   : > { %1344 = vrcp.f32 %v954_v34  ;;  %v962_v37 = vadd.f32 1.0, %v1343_v35 }
 0x121   : > { %1346 = vrcp.f32 %v962_v37 }
 0x129   : > { %v1345_v39 = vpop.eup %1344 }
 0x12a   : > { %v966_v41 = vmul.f32 %v1345_v39, %v944_v38 }
 0x12b   : > { %v1347_v43 = vpop.eup %1346 }
 0x12c   : > { %v967_v42 = vadd.f32 %v966_v41, %v965_v40  ;;  %v969_v44 = vsub.f32 1.0, %v1347_v43  ;;  %v971_v48 = vmul.f32 %v1347_v43, %v1557_v3 }
 0x12e   : > { %1348 = vtanh.f32 %v967_v42 }
 0x138   : > { %v1349_v46 = vpop.eup %1348 }
 0x139   : > { %v970_v47 = vmul.f32 %v1349_v46, %v969_v44 }
 0x13a   : > { %991 = sbr.rel (%p1263_p8) target bundleno = 321 (0x141), region = 72 }
 0x13b   : > { %v972_v49 = vadd.f32 %v971_v48, %v970_v47 }
 0x13d   : > { %v981_v50 = vsel %vm980_vm4, %v972_v49, %v1557_v3  ;;  %v984_v51 = vsel %vm980_vm4, %v972_v49, 0.0 }
 0x13e   : > { %983 = vst.msk [vmem:[#allocation2] sm:$0x3] %vm982_vm5, %v981_v50  ;;  %v985_v52 = vpack.c.bf16 %v984_v51, %v984_v51  ;;  %992 = vst.msk [vmem:[%s1554_s13] sm:$0x3] (!%p1263_p8), %vm982_vm5, %v981_v50 }
 0x140   : > { %987 = vst.msk [vmem:[%s755_s29] sm:$0x1] %vm986_vm6, %v985_v52 }
 0x141 PF: > { %s1668_s15 = sld [smem:[#allocation6_spill]]  ;;  %s1669_s21 = sld [smem:[#allocation4_spill]] }
 0x142   : > { %s1670_s22 = sld [smem:[#allocation5_spill]]  ;;  %s1671_s23 = sld [smem:[#allocation7_spill]] }
 0x143   : > { %s1672_s24 = sld [smem:[#allocation8_spill]] }
 0x147   : > { %s23_s25 = sadd.s32 1, %s1668_s15  }
 0x148   : > { %p20_p9 = scmp.ge.s32.totalorder %s23_s25, 18  }
 0x14a   :  { %22 = sbr.rel (!%p20_p9) target bundleno = 8 (0x8), region = 141 }

// kernel: seq2seq_forward.11
= control target key start
LH: loop header
LB: loop body
LE: loop exit
PB: predicated region body
PF: predicated region fallthrough
CT: control target
= control target key end

     0   :  { %vm49_vm0 = vcmask 1043456   ;;  %v252_v0 = vmov 0.0   ;;  %vm253_vm1 = vmmov 0   ;;  %vm45_vm2 = vcmask 64512   ;;  %s355_s1 = inlined_call_operand.vmem [shape: bf16[1,8,16], index: 1, kind: input, shape index: {}]   ;;  %s356_s0 = inlined_call_operand.vmem [shape: bf16[12,8], index: 0, kind: input, shape index: {}]   ;;  %s357_s3 = inlined_call_operand.vmem [shape: bf16[1,8,16], index: 3, kind: input, shape index: {}]   ;;  %s358_s2 = inlined_call_operand.vmem [shape: bf16[1,8,16], index: 2, kind: input, shape index: {}]   ;;  %s359_s4 = inlined_call_operand.vmem [shape: f32[1,1,16], index: 4, kind: input, shape index: {}]   ;;  %s360_s5 = inlined_call_operand.vmem [shape: f32[1,1,16], index: 5, kind: input, shape index: {}]   ;;  %s361_s7 = inlined_call_operand.vmem [shape: f32[1,12,16], index: 7, kind: output, shape index: {0}]   ;;  %s362_s8 = inlined_call_operand.vmem [shape: f32[1,12,16], index: 8, kind: output, shape index: {1}]   ;;  %s363_s6 = inlined_call_operand.vmem [shape: f32[1,1,16], index: 6, kind: input, shape index: {}]   ;;  %s364_s9 = inlined_call_operand.vmem [shape: f32[1,12,16], index: 9, kind: output, shape index: {2}]  }
   0x1   :  { %231 = vmatprep.subr.bf16.mxu0 %v252_v0  ;;  %v32_v1 = vld [vmem:[%s355_s1] sm:$0xf]  ;;  %233 = vmatprep.mubr.msk.bf16.mxu0 %vm253_vm1, %v252_v0  ;;  %vm94_vm3 = vcmask 130048   ;;  %vm96_vm4 = vcmask 125952  }
   0x2   :  { %v51_v2 = vsel %vm49_vm0, %v32_v1, 0  ;;  %v251_v3 = vld [vmem:[%s356_s0] sm:$0x3f]   ;;  %237 = vmatprep.subr.bf16.mxu1 %v252_v0  ;;  %239 = vmatprep.mubr.msk.bf16.mxu1 %vm253_vm1, %v252_v0 }
   0x3   :  { %v152_v4 = vld [vmem:[%s357_s3] sm:$0xf]  ;;  %232 = vmatpush3.bf16.msra.mxu0 %v51_v2 }
   0x4   :  { %v98_v5 = vld [vmem:[%s358_s2] sm:$0xf]  ;;  %243 = vmatprep.subr.bf16.mxu0 %v252_v0  ;;  %v161_v6 = vsel %vm49_vm0, %v152_v4, 0 }
   0x5   :  { %v107_v7 = vsel %vm49_vm0, %v98_v5, 0  ;;  %v218_v8 = vld [vmem:[%s359_s4] ss:$0 sm:$0xff] }
   0x6   :  { %238 = vmatpush3.bf16.msra.mxu1 %v107_v7  ;;  %234 = vmatmul.mubr.msk.bf16.vlgmr.msra.gmra.mrb[0].mxu0 %vm45_vm2, %v251_v3  ;;  %v221_v10 = vld [vmem:[%s360_s5] ss:$0 sm:$0xff] }
   0x7   :  { %244 = vmatpush3.bf16.msra.mxu0 %v161_v6  ;;  %245 = vmatprep.mubr.msk.bf16.mxu0 %vm253_vm1, %v252_v0  ;;  %v223_v22 = vld [vmem:[%s363_s6] ss:$0 sm:$0xff] }
   0x9   :  { %240 = vmatmul.mubr.msk.bf16.vlgmr.msra.gmra.mrb[0].mxu1 %vm45_vm2, %v251_v3 }
   0xe   :  { %246 = vmatmul.mubr.msk.bf16.vlgmr.msra.gmra.mrb[4].mxu0 %vm45_vm2, %v251_v3 }
  0xd9   :  { %v87_v9 = vpop.f32.mrb[0].mxu0 }
  0xda   :  { %v88_v11 = vadd.f32 %v218_v8, %v87_v9  ;;  %v235_v12 = vpop.f32.mrb[1].mxu0 }
  0xdb   :  { %v90_v13 = vpop.f32.mrb[2].mxu0 }
  0xdc   :  { %v143_v14 = vpop.f32.mrb[0].mxu1  ;;  %95 = vst.msk [vmem:[%s361_s7] sm:$0xff] %vm94_vm3, %v88_v11  ;;  %v91_v15 = vadd.f32 %v218_v8, %v90_v13  ;;  %v236_v16 = vpop.f32.mrb[3].mxu0 }
  0xdd   :  { %v144_v17 = vadd.f32 %v221_v10, %v143_v14  ;;  %v241_v18 = vpop.f32.mrb[1].mxu1 }
  0xde   :  { %v146_v19 = vpop.f32.mrb[2].mxu1  ;;  %97 = vst.msk [vmem:[%s361_s7 + $0x8] sm:$0xf] %vm96_vm4, %v91_v15 }
  0xdf   :  { %150 = vst.msk [vmem:[%s362_s8] sm:$0xff] %vm94_vm3, %v144_v17  ;;  %v147_v20 = vadd.f32 %v221_v10, %v146_v19  ;;  %v242_v21 = vpop.f32.mrb[3].mxu1 }
  0xe1   :  { %151 = vst.msk [vmem:[%s362_s8 + $0x8] sm:$0xf] %vm96_vm4, %v147_v20  ;;  %v197_v23 = vpop.f32.mrb[4].mxu0 }
  0xe2   :  { %v198_v24 = vadd.f32 %v223_v22, %v197_v23  ;;  %v247_v25 = vpop.f32.mrb[5].mxu0 }
  0xe3   :  { %v200_v26 = vpop.f32.mrb[6].mxu0 }
  0xe4   :  { %204 = vst.msk [vmem:[%s364_s9] sm:$0xff] %vm94_vm3, %v198_v24  ;;  %v201_v27 = vadd.f32 %v223_v22, %v200_v26  ;;  %v248_v28 = vpop.f32.mrb[7].mxu0 }
  0xe6   :  { %205 = vst.msk [vmem:[%s364_s9 + $0x8] sm:$0xf] %vm96_vm4, %v201_v27 }

// kernel: seq2seq_forward.14
= control target key start
LH: loop header
LB: loop body
LE: loop exit
PB: predicated region body
PF: predicated region fallthrough
CT: control target
= control target key end

     0   :  { %vm21_vm0 = vcmask 7168   ;;  %vm23_vm1 = vcmask 3072   ;;  %v202_v0 = vmov 0.0   ;;  %vm203_vm2 = vmmov 0   ;;  %s269_s1 = inlined_call_operand.vmem [shape: bf16[16,16], index: 1, kind: input, shape index: {}]   ;;  %s270_s0 = inlined_call_operand.vmem [shape: bf16[12,16], index: 0, kind: input, shape index: {}]   ;;  %s271_s2 = inlined_call_operand.vmem [shape: f32[1,16], index: 2, kind: input, shape index: {}]   ;;  %s272_s3 = inlined_call_operand.vmem [shape: f32[12,16], index: 3, kind: output, shape index: {0}]   ;;  %s273_s4 = inlined_call_operand.vmem [shape: f32[12,1], index: 4, kind: output, shape index: {1}]  }
   0x1   :  { %25 = vst.msk [vmem:[#allocation3] sm:$0xff] %vm21_vm0, %v202_v0  ;;  %176 = vmatprep.subr.bf16.mxu0 %v202_v0  ;;  %v188_v1 = vld [vmem:[%s269_s1] sm:$0xff]   ;;  %178 = vmatprep.mubr.msk.bf16.mxu0 %vm203_vm2, %v202_v0  ;;  %vm49_vm3 = vcmask 130048   ;;  %v204_v3 = vmov -inf   ;;  %vm95_vm4 = vcmask 125952   ;;  %v205_v13 = vmov 0  }
   0x2   :  { %26 = vst.msk [vmem:[#allocation3 + $0x8] sm:$0xf] %vm23_vm1, %v202_v0  ;;  %v189_v2 = vld [vmem:[%s270_s0] sm:$0x3f]   ;;  %177 = vmatpush3.bf16.msra.mxu0 %v188_v1  ;;  %24 = vst.msk [vmem:[#allocation2 + $0x8] sm:$0xf] %vm23_vm1, %v204_v3  ;;  %186 = vset.pattern.permute.xlu1 %v205_v13 }
   0x3   :  { %22 = vst.msk [vmem:[#allocation2] sm:$0xff] %vm21_vm0, %v204_v3  ;;  %v170_v4 = vld [vmem:[%s271_s2] ss:$0 sm:$0xff]  ;;  %187 = vset.pattern.permute.xlu0 %v205_v13 }
   0x5   :  { %179 = vmatmul.mubr.msk.bf16.vlgmr.msra.gmra.mrb[0].mxu0 %vm49_vm3, %v189_v2 }
   0x8   :  { %v107_v35 = vld [vmem:[#allocation3] sm:$0xff] }
   0x9   :  { %v98_v17 = vld [vmem:[#allocation2 + $0x8] sm:$0xf]  ;;  %v108_v39 = vld [vmem:[#allocation3 + $0x8] sm:$0xf] }
   0xa   :  { %v97_v14 = vld [vmem:[#allocation2] sm:$0xff] }
  0xd8   :  { %v87_v5 = vpop.f32.mrb[0].mxu0 }
  0xd9   :  { %v88_v6 = vadd.f32 %v170_v4, %v87_v5  ;;  %v180_v7 = vpop.f32.mrb[1].mxu0 }
  0xda   :  { %v90_v8 = vpop.f32.mrb[2].mxu0 }
  0xdb   :  { %94 = vst.msk [vmem:[%s272_s3] sm:$0xff] %vm49_vm3, %v88_v6  ;;  %v91_v9 = vadd.f32 %v170_v4, %v90_v8  ;;  %v181_v10 = vpop.f32.mrb[3].mxu0  ;;  %v99_v11 = vsel %vm49_vm3, %v88_v6, -inf }
  0xdc   :  { %100 = vmax.xlane.f32.xlu0 %v99_v11 }
  0xdd   :  { %96 = vst.msk [vmem:[%s272_s3 + $0x8] sm:$0xf] %vm95_vm4, %v91_v9  ;;  %v102_v12 = vsel %vm95_vm4, %v91_v9, -inf }
  0xe0   :  { %103 = vmax.xlane.f32.xlu0 %v102_v12 }
 0x169   :  { %v101_v15 = vpop.xlane.xlu0 %100 }
 0x16a   :  { %v105_v16 = vmax.f32 %v97_v14, %v101_v15 }
 0x16c   :  { %v109_v18 = vsub.f32 %v97_v14, %v105_v16  ;;  %145 = vst.msk [vmem:[#allocation2] sm:$0xff] %vm21_vm0, %v105_v16  ;;  %119 = vperm.xlu1 %186, %v105_v16  }
 0x16d   :  { %v104_v19 = vpop.xlane.xlu0 %103 }
 0x16e   :  { %v106_v20 = vmax.f32 %v98_v17, %v104_v19  ;;  %v111_v32 = vmul.f32 1.442695, %v109_v18 }
 0x170   :  { %v110_v21 = vsub.f32 %v98_v17, %v106_v20  ;;  %146 = vst.msk [vmem:[#allocation2 + $0x8] sm:$0xf] %vm23_vm1, %v106_v20  ;;  %124 = vperm.xlu1 %186, %v106_v20  }
 0x172   :  { %v113_v33 = vmul.f32 1.442695, %v110_v21 }
 0x173   :  { %v150_v48 = vld [vmem:[#allocation2] sm:$0xff] }
 0x177   :  { %v151_v52 = vld [vmem:[#allocation2 + $0x8] sm:$0xf] }
 0x1eb   :  { %v120_v22 = vpop.permute.xlu1 %119 }
 0x1ec   :  { %v127_v23 = vsub.f32 %v88_v6, %v120_v22 }
 0x1ee   :  { %v129_v24 = vmul.f32 1.442695, %v127_v23 }
 0x1ef   :  { %v125_v25 = vpop.permute.xlu1 %124 }
 0x1f0   :  { %190 = vpow2.f32 %v129_v24  ;;  %v128_v26 = vsub.f32 %v91_v9, %v125_v25 }
 0x1f2   :  { %v131_v27 = vmul.f32 1.442695, %v128_v26 }
 0x1f4   :  { %192 = vpow2.f32 %v131_v27 }
 0x1f5   :  { %194 = vpow2.f32 %v111_v32 }
 0x1f6   :  { %196 = vpow2.f32 %v113_v33 }
 0x1fa   :  { %v191_v28 = vpop.eup %190 }
 0x1fb   :  { %v133_v29 = vsel %vm49_vm3, %v191_v28, 0.0 }
 0x1fc   :  { %134 = vadd.xlane.f32.xlu0 %v133_v29 }
 0x1fe   :  { %v193_v30 = vpop.eup %192 }
 0x1ff   :  { %v136_v31 = vsel %vm95_vm4, %v193_v30, 0.0  ;;  %v195_v34 = vpop.eup %194 }
 0x200   :  { %137 = vadd.xlane.f32.xlu1 %v136_v31  ;;  %v115_v36 = vmul.f32 %v195_v34, %v107_v35  ;;  %v197_v37 = vpop.eup %196 }
 0x201   :  { %v116_v41 = vmul.f32 %v197_v37, %v108_v39 }
 0x289   :  { %v135_v38 = vpop.xlane.xlu0 %134 }
 0x28a   :  { %v139_v40 = vadd.f32 %v135_v38, %v115_v36 }
 0x28c   :  { %142 = vst.msk [vmem:[#allocation3] sm:$0xff] %vm21_vm0, %v139_v40 }
 0x28d   :  { %v138_v42 = vpop.xlane.xlu1 %137 }
 0x28e   :  { %v140_v43 = vadd.f32 %v138_v42, %v116_v41 }
 0x290   :  { %144 = vst.msk [vmem:[#allocation3 + $0x8] sm:$0xf] %vm23_vm1, %v140_v43 }
 0x293   :  { %v152_v44 = vld [vmem:[#allocation3] sm:$0xff] }
 0x294   :  { %198 = vlog2.f32 %v152_v44 }
 0x297   :  { %v153_v45 = vld [vmem:[#allocation3 + $0x8] sm:$0xf] }
 0x298   :  { %200 = vlog2.f32 %v153_v45 }
 0x29e   :  { %v199_v46 = vpop.eup %198 }
 0x29f   :  { %v155_v47 = vmul.f32 0.6931472, %v199_v46 }
 0x2a1   :  { %v158_v49 = vadd.f32 %v155_v47, %v150_v48 }
 0x2a2   :  { %v201_v50 = vpop.eup %200 }
 0x2a3   :  { %160 = vst.msk [vmem:[%s273_s4] sm:$0xff] %vm21_vm0, %v158_v49  ;;  %v157_v51 = vmul.f32 0.6931472, %v201_v50 }
 0x2a5   :  { %v159_v53 = vadd.f32 %v157_v51, %v151_v52 }
 0x2a7   :  { %161 = vst.msk [vmem:[%s273_s4 + $0x8] sm:$0xf] %vm23_vm1, %v159_v53 }

// kernel: seq2seq_forward.12
= control target key start
LH: loop header
LB: loop body
LE: loop exit
PB: predicated region body
PF: predicated region fallthrough
CT: control target
= control target key end

     0   :  { %18 = vsyncpa [#allocation4], 0  ;;  %s1466_s21 = smov 0   ;;  %s1468_s22 = smov 0   ;;  %s1603_s0 = inlined_call_operand.vmem [shape: f32[1,6,2,16], index: 0, kind: input, shape index: {}]   ;;  %s1604_s1 = inlined_call_operand.vmem [shape: f32[1,6,2,16], index: 1, kind: input, shape index: {}]   ;;  %s1605_s2 = inlined_call_operand.vmem [shape: f32[1,6,2,16], index: 2, kind: input, shape index: {}]   ;;  %s1606_s3 = inlined_call_operand.vmem [shape: s32[2,1], index: 3, kind: input, shape index: {}]   ;;  %s1607_s4 = inlined_call_operand.vmem [shape: f32[1,2,16], index: 4, kind: input, shape index: {}]   ;;  %s1608_s5 = inlined_call_operand.vmem [shape: bf16[1,16,16], index: 5, kind: input, shape index: {}]   ;;  %s1609_s6 = inlined_call_operand.vmem [shape: bf16[1,16,16], index: 6, kind: input, shape index: {}]   ;;  %s1610_s7 = inlined_call_operand.vmem [shape: bf16[1,16,16], index: 7, kind: input, shape index: {}]   ;;  %s1611_s8 = inlined_call_operand.vmem [shape: f32[1,1,16], index: 8, kind: input, shape index: {}]   ;;  %s1612_s9 = inlined_call_operand.vmem [shape: f32[1,1,16], index: 9, kind: input, shape index: {}]   ;;  %s1613_s10 = inlined_call_operand.vmem [shape: f32[1,1,16], index: 10, kind: input, shape index: {}]   ;;  %s1614_s11 = inlined_call_operand.vmem [shape: bf16[1,6,2,16], index: 11, kind: output, shape index: {0}]   ;;  %s1615_s12 = inlined_call_operand.hbm [shape: f32[1,2,16], index: 12, kind: output, shape index: {1}]  }
   0x1   :  { %s1470_s23 = smov 0  }
   0x2 LB: > { %s33_s25 = sadd.s32 1, %s1391_s22  ;;  %p1250_p1 = scmp.ge.s32.totalorder %s1395_s23, 1  ;;  %s1395_s23 = sphi %s1470_s23, %s24_s23   ;;  %s1391_s22 = sphi %s1468_s22, %s1619_s22   ;;  %s1387_s21 = sphi %s1466_s21, %s1618_s21  }
   0x3   : > { %p34_p0 = scmp.ge.s32.totalorder %s33_s25, 6  ;;  %p548_p2 = scmp.lt.s32.totalorder %s1395_s23, 7 }
   0x5   : > { %s1621_s25 = smov (%p34_p0, %s33_s25), 0  ;;  %p549_p3 = pnand %p1250_p1, %p548_p2 }
   0x6   : > { %p666_p4 = scmp.lt.s32.totalorder (!%p549_p3), %s1387_s21, 5  ;;  %p1254_p5 = scmp.ne.s32.totalorder (!%p549_p3), %s1387_s21, 0 }
   0x7   : > { %552 = sbr.rel (%p549_p3) target bundleno = 317 (0x13d), region = 64 }
   0xe   : > { %s1489_s26 = scalar_select %p666_p4, %s1387_s21, 5 }
   0xf   : > { %767 = sbr.rel (%p1254_p5) target bundleno = 22 (0x16), region = 68  ;;  %v768_v0 = vld [vmem:[%s1607_s4] sm:$0x3] (!%p1254_p5)  ;;  %vm769_vm0 = vcmask (!%p1254_p5), 123904  }
  0x10   : > { %s1492_s27 = sshll.u32 %s1489_s26, 1  ;;  %s752_s30 = scalar_lea.vmem %s1614_s11, %s1489_s26  ;;  %770 = vst.msk [vmem:[#allocation2] sm:$0x3] (!%p1254_p5), %vm769_vm0, %v768_v0 }
  0x11   : > { %s671_s15 = scalar_lea.vmem %s1603_s0, %s1492_s27  ;;  %s689_s18 = scalar_lea.vmem %s1604_s1, %s1492_s27 }
  0x12   : > { %s707_s24 = scalar_lea.vmem %s1605_s2, %s1492_s27 }
  0x16 PF: > { %v1330_v1 = vld [vmem:[%s1608_s5] sm:$0xff]   ;;  %v1397_v2 = vmov 0.0   ;;  %vm788_vm1 = vcmask 130048   ;;  %v967_v4 = vstv %s1387_s21  ;;  %vm1398_vm2 = vmmov 0   ;;  %p1266_p6 = scmp.ne.s32.totalorder %s1387_s21, 5 }
  0x17   : > { %1277 = vmatprep.subr.bf16.mxu0 %v1397_v2  ;;  %v1517_v3 = vld [vmem:[#allocation2] sm:$0x3]  ;;  %1283 = vmatprep.subr.bf16.mxu1 %v1397_v2  ;;  %v1399_v9 = vmov 0   ;;  %vm975_vm5 = vcmask 123904   ;;  %vm979_vm6 = vcmask 122880  }
  0x18   : > { %1278 = vmatpush3.bf16.msra.mxu0 %v1330_v1  ;;  %1279 = vmatprep.mubr.msk.bf16.mxu0 %vm1398_vm2, %v1397_v2  ;;  %v772_v5 = vpack.c.bf16 %v1517_v3, %v1517_v3  ;;  %v1331_v6 = vld [vmem:[%s1609_s6] sm:$0xff]  }
  0x19   : > { %1285 = vmatprep.mubr.msk.bf16.mxu1 %vm1398_vm2, %v1397_v2  ;;  %1289 = vmatprep.subr.bf16.mxu0 %v1397_v2  ;;  %v1332_v7 = vld [vmem:[%s1610_s7] sm:$0xff]  }
  0x1a   : > { %v966_v8 = vld [vmem:[%s1606_s3] sm:$0x3]  ;;  %1284 = vmatpush3.bf16.msra.mxu1 %v1331_v6  ;;  %1329 = vset.pattern.permute.xlu0 %v1399_v9 }
  0x1b   : > { %vm968_vm3 = vcmp.lt.s32.totalorder %v967_v4, %v966_v8  ;;  %1280 = vmatmul.mubr.msk.bf16.vlgmr.msra.gmra.mrb[0].mxu0 %vm788_vm1, %v772_v5  ;;  %v1255_v11 = vld [vmem:[%s1611_s8] ss:$0 sm:$0xff] }
  0x1c   : > { %v969_v10 = vsel %vm968_vm3, 1, %v1399_v9  ;;  %1290 = vmatpush3.bf16.msra.mxu0 %v1332_v7  ;;  %1291 = vmatprep.mubr.msk.bf16.mxu0 %vm1398_vm2, %v1397_v2  ;;  %v942_v13 = vld [vmem:[%s671_s15] sm:$0x3] }
  0x1d   : > { %1286 = vmatmul.mubr.msk.bf16.vlgmr.msra.gmra.mrb[0].mxu1 %vm788_vm1, %v772_v5  ;;  %971 = vperm.xlu0 %1329, %v969_v10   ;;  %v1258_v14 = vld [vmem:[%s1612_s9] ss:$0 sm:$0xff] }
  0x1e   : > { %v950_v19 = vld [vmem:[%s689_s18] sm:$0x3] }
  0x1f   : > { %v1261_v36 = vld [vmem:[%s1613_s10] ss:$0 sm:$0xff] }
  0x20   : > { %v958_v40 = vld [vmem:[%s707_s24] sm:$0x3] }
  0x23   : > { %1292 = vmatmul.mubr.msk.bf16.vlgmr.msra.gmra.mrb[4].mxu0 %vm788_vm1, %v772_v5 }
  0x9c   : > { %v972_v45 = vpop.permute.xlu0 %971 }
  0x9d   : > { %vm973_vm4 = vcmp.eq.s32.totalorder %v972_v45, 1 }
  0xee   : > { %v826_v12 = vpop.f32.mrb[0].mxu0 }
  0xef   : > { %v827_v15 = vadd.f32 %v1255_v11, %v826_v12  ;;  %v1281_v16 = vpop.f32.mrb[1].mxu0 }
  0xf0   : > { %v829_v17 = vpop.f32.mrb[2].mxu0  ;;  %v881_v18 = vpop.f32.mrb[0].mxu1 }
  0xf1   : > { %v943_v20 = vadd.f32 %v942_v13, %v827_v15  ;;  %v1282_v21 = vpop.f32.mrb[3].mxu0  ;;  %v882_v22 = vadd.f32 %v1258_v14, %v881_v18  ;;  %v1287_v23 = vpop.f32.mrb[1].mxu1 }
  0xf2   : > { %v884_v24 = vpop.f32.mrb[2].mxu1 }
  0xf3   : > { %v1264_v25 = vmul.f32 -1.442695, %v943_v20  ;;  %v951_v26 = vadd.f32 %v950_v19, %v882_v22  ;;  %v1288_v27 = vpop.f32.mrb[3].mxu1 }
  0xf5   : > { %1333 = vpow2.f32 %v1264_v25  ;;  %v1265_v28 = vmul.f32 -1.442695, %v951_v26 }
  0xf6   : > { %v936_v29 = vpop.f32.mrb[4].mxu0 }
  0xf7   : > { %v1293_v30 = vpop.f32.mrb[5].mxu0  ;;  %1335 = vpow2.f32 %v1265_v28  ;;  %v937_v38 = vadd.f32 %v1261_v36, %v936_v29 }
  0xf8   : > { %v939_v31 = vpop.f32.mrb[6].mxu0 }
  0xf9   : > { %v1294_v32 = vpop.f32.mrb[7].mxu0 }
  0xff   : > { %v1334_v33 = vpop.eup %1333 }
 0x100   : > { %v947_v34 = vadd.f32 1.0, %v1334_v33 }
 0x101   : > { %v1336_v35 = vpop.eup %1335 }
 0x102   : > { %1337 = vrcp.f32 %v947_v34  ;;  %v955_v37 = vadd.f32 1.0, %v1336_v35 }
 0x104   : > { %1339 = vrcp.f32 %v955_v37 }
 0x10c   : > { %v1338_v39 = vpop.eup %1337 }
 0x10d   : > { %v959_v41 = vmul.f32 %v1338_v39, %v937_v38 }
 0x10e   : > { %v1340_v43 = vpop.eup %1339 }
 0x10f   : > { %v960_v42 = vadd.f32 %v959_v41, %v958_v40  ;;  %v962_v44 = vsub.f32 1.0, %v1340_v43  ;;  %v964_v48 = vmul.f32 %v1340_v43, %v1517_v3 }
 0x111   : > { %1341 = vtanh.f32 %v960_v42 }
 0x11b   : > { %v1342_v46 = vpop.eup %1341 }
 0x11c   : > { %v963_v47 = vmul.f32 %v1342_v46, %v962_v44 }
 0x11d   : > { %984 = sbr.rel (%p1266_p6) target bundleno = 292 (0x124), region = 72 }
 0x11e   : > { %v965_v49 = vadd.f32 %v964_v48, %v963_v47 }
 0x120   : > { %v974_v50 = vsel %vm973_vm4, %v965_v49, %v1517_v3  ;;  %v977_v51 = vsel %vm973_vm4, %v965_v49, 0.0 }
 0x121   : > { %976 = vst.msk [vmem:[#allocation2] sm:$0x3] %vm975_vm5, %v974_v50  ;;  %v978_v52 = vpack.c.bf16 %v977_v51, %v977_v51  ;;  %985 = vst.msk [vmem:[#allocation3] sm:$0x3] (!%p1266_p6), %vm975_vm5, %v974_v50 }
 0x123   : > { %980 = vst.msk [vmem:[%s752_s30] sm:$0x1] %vm979_vm6, %v978_v52 }
 0x124 PF: > { %s1616_s16 = sadd.s32 4294967295, %s1395_s23   ;;  %s1400_s19 = smov [#allocation3]  }
 0x125   : > { %p1568_p7 = scmp.eq.s32.totalorder %s1616_s16, 5  ;;  %s1015_s20 = sshll.u32 %s1400_s19, 4  ;;  %s1016_s20 = int_to_ptr.vmem [resolvable:$true] %s1015_s20 }
 0x126   : > { %s1343_s28 = scalar_lea.vmem %s1016_s20, 32  ;;  %p1350_p11 = scmp.lt.s32.totalorder %s1016_s20, %s1016_s20 }
 0x127   : > { %p1344_p8 = scmp.ne.s32.totalorder %s1016_s20, %s1343_s28  ;;  %p1351_p12 = scmp.lt.s32.totalorder %s1343_s28, %s1343_s28 }
 0x129   : > { %p1345_p9 = pnand %p1344_p8, %p1568_p7  ;;  %p1352_p13 = por %p1351_p12, %p1350_p11 }
 0x12b   : > { %p1346_p10 = pneg %p1345_p9 }
 0x12d   : > { %p1353_p0 = pnand %p1352_p13, %p1346_p10 }
 0x12f   : > { %1356 = shalt.err (!%p1353_p0)
}
 0x130   : > { %s1357_s30 = scalar_lea.hbm %s1615_s12, 32 }
 0x131   : > { %p1358_p1 = scmp.ne.s32.totalorder %s1615_s12, %s1357_s30  ;;  %p1363_p4 = scmp.lt.u32.totalorder %s1357_s30, %s1615_s12 }
 0x133   : > { %p1359_p2 = pnand %p1358_p1, %p1568_p7 }
 0x135   : > { %p1360_p3 = pneg %p1359_p2 }
 0x137   : > { %p1365_p5 = pnand %p1363_p4, %p1360_p3 }
 0x139   : > { %1368 = shalt.err (!%p1365_p5)
}
 0x13a   : > { %1296 = dma.vmem_to_hbm [thread:$0]  (%p1568_p7), %s1016_s20, 32, %s1615_s12, [#allocation4]  }
 0x13b   : > { %1382 = dma.done.wait (%p1568_p7), [#allocation4], 32  }
 0x13c   : > { %1384 = vsyncadd (%p1568_p7), [#allocation4], 4294967264 }
 0x13d PF: > { %s24_s23 = sadd.s32 1, %s1395_s23   ;;  %s1618_s21 = smov %s1391_s22 }
 0x13e   : > { %p21_p6 = scmp.ge.s32.totalorder %s24_s23, 8   ;;  %s1619_s22 = smov %s1621_s25 }
 0x140   :  { %23 = sbr.rel (!%p21_p6) target bundleno = 2 (0x2), region = 139 }
 0x147   :  { %1043 = vsyncpa [#allocation4], 1 }
 0x148   :  { %1045 = vsyncpa [#allocation4 + $0x1], 1 }

// kernel: seq2seq_forward.15
= control target key start
LH: loop header
LB: loop body
LE: loop exit
PB: predicated region body
PF: predicated region fallthrough
CT: control target
= control target key end

     0   :  { %v37_v0 = vmov 0   ;;  %vm27_vm0 = vcmask 130048   ;;  %vm29_vm1 = vcmask 125952   ;;  %s71_s1 = inlined_call_operand.vmem [shape: f32[12,1], index: 1, kind: input, shape index: {}]   ;;  %s72_s0 = inlined_call_operand.vmem [shape: f32[12,16], index: 0, kind: input, shape index: {}]   ;;  %s73_s2 = inlined_call_operand.vmem [shape: f32[12,16], index: 2, kind: output, shape index: {}]  }
   0x1   :  { %36 = vset.pattern.permute.xlu0 %v37_v0  ;;  %v13_v1 = vld [vmem:[%s71_s1] sm:$0xff]  ;;  %v14_v2 = vld [vmem:[%s71_s1 + $0x8] sm:$0xf] }
   0x2   :  { %17 = vperm.xlu0 %36, %v13_v1   ;;  %v11_v3 = vld [vmem:[%s72_s0] sm:$0xff]  ;;  %v12_v6 = vld [vmem:[%s72_s0 + $0x8] sm:$0xf] }
   0x6   :  { %22 = vperm.xlu0 %36, %v14_v2  }
  0x81   :  { %v18_v4 = vpop.permute.xlu0 %17 }
  0x82   :  { %v25_v5 = vsub.f32 %v11_v3, %v18_v4 }
  0x84   :  { %28 = vst.msk [vmem:[%s73_s2] sm:$0xff] %vm27_vm0, %v25_v5 }
  0x85   :  { %v23_v7 = vpop.permute.xlu0 %22 }
  0x86   :  { %v26_v8 = vsub.f32 %v12_v6, %v23_v7 }
  0x88   :  { %30 = vst.msk [vmem:[%s73_s2 + $0x8] sm:$0xf] %vm29_vm1, %v26_v8 }

// kernel: seq2seq_forward.13
= control target key start
LH: loop header
LB: loop body
LE: loop exit
PB: predicated region body
PF: predicated region fallthrough
CT: control target
= control target key end

     0   :  { %v791_v0 = vmov 0.0   ;;  %vm792_vm0 = vmmov 0   ;;  %vm57_vm1 = vcmask 261120   ;;  %v197_v6 = vlaneseq  ;;  %s971_s4 = inlined_call_operand.vmem [shape: bf16[32,16], index: 4, kind: input, shape index: {}]   ;;  %s972_s1 = inlined_call_operand.vmem [shape: bf16[2,8,32], index: 1, kind: input, shape index: {}]   ;;  %s973_s3 = inlined_call_operand.vmem [shape: s32[2,1], index: 3, kind: input, shape index: {}]   ;;  %s974_s2 = inlined_call_operand.vmem [shape: s32[2,1], index: 2, kind: input, shape index: {}]   ;;  %s975_s0 = inlined_call_operand.vmem [shape: bf16[2,6,16], index: 0, kind: input, shape index: {}]   ;;  %s976_s9 = inlined_call_operand.vmem [shape: f32[2,6,8], index: 9, kind: output, shape index: {1}]   ;;  %s977_s5 = inlined_call_operand.vmem [shape: bf16[32,16], index: 5, kind: input, shape index: {}]   ;;  %s978_s6 = inlined_call_operand.vmem [shape: bf16[16,16], index: 6, kind: input, shape index: {}]   ;;  %s979_s7 = inlined_call_operand.vmem [shape: f32[1,16], index: 7, kind: input, shape index: {}]   ;;  %s980_s8 = inlined_call_operand.vmem [shape: f32[12,16], index: 8, kind: output, shape index: {0}]  }
   0x1   :  { %720 = vmatprep.subr.bf16.mxu0 %v791_v0  ;;  %v773_v1 = vld [vmem:[%s971_s4] sm:$0xff]   ;;  %724 = vmatprep.mubr.msk.bf16.mxu0 %vm792_vm0, %v791_v0  ;;  %v774_v2 = vld [vmem:[%s971_s4 + $0x8] sm:$0xff]   ;;  %v793_v7 = vmov 1966171168   ;;  %v794_v11 = vmov 0   ;;  %vm104_vm2 = vcmask 130048  }
   0x2   :  { %728 = vmatprep.subr.bf16.mxu1 %v791_v0  ;;  %730 = vmatprep.mubr.msk.bf16.mxu1 %vm792_vm0, %v791_v0  ;;  %v861_v3 = vld [vmem:[%s972_s1] sm:$0xf]  ;;  %v866_v4 = vld [vmem:[%s972_s1 + $0x4] sm:$0xf]  ;;  %v211_v8 = vunpack.c.l.s4 %v793_v7  ;;  %v875_v9 = vshrl.u32 %v197_v6, 7  ;;  %v200_v38 = vand.u32 127, %v197_v6 }
   0x3   :  { %721 = vmatpush3.bf16.msra.mxu0 %v773_v1  ;;  %v688_v5 = vcombine.low %v861_v3, %v866_v4  ;;  %771 = vset.pattern.permute.xlu0 %v794_v11  ;;  %v694_v12 = vld.sshfl [vmem:[%s973_s3] sm:$0x11 pattern:$0x75316420]  ;;  %v903_v35 = vld [vmem:[%s975_s0 + $0x4] sm:$0x7] }
   0x4   :  { %722 = vmatprep.subr.bf16.mxu0 %v791_v0  ;;  %v212_v10 = vunpack.c.0.s8 %v211_v8  ;;  %772 = vset.pattern.permute.xlu1 %v794_v11  ;;  %v209_v13 = vcombine.high %v694_v12, %v694_v12  ;;  %v695_v14 = vld.sshfl [vmem:[%s974_s2] sm:$0x11 pattern:$0x75316420]  ;;  %v226_v17 = vsub.s32 0, %v875_v9  ;;  %vm283_vm7 = vcmask 62464  }
   0x5   :  { %v248_v16 = vcombine.high %v695_v14, %v695_v14  ;;  %v898_v34 = vld [vmem:[%s975_s0] sm:$0x7]  ;;  %vm314_vm10 = vcmask 1043456   ;;  %vm310_vm11 = vcmask 64512   ;;  %vm678_vm12 = vcmask 125952  }
   0x6   :  { %v884_v15 = vsub.s32 %v212_v10, %v875_v9  ;;  %v316_v63 = vsel %vm314_vm10, %v861_v3, 0  ;;  %v362_v1 = vsel %vm314_vm10, %v866_v4, 0 }
   0x7   :  { %723 = vmatpush3.bf16.msra.mxu0 %v774_v2 }
   0x8   :  { %734 = vmatprep.subr.bf16.mxu0 %v791_v0  ;;  %v216_v18 = vrot.slane %v694_v12, %v884_v15  ;;  %v223_v19 = vrot.slane %v209_v13, %v884_v15  ;;  %v255_v20 = vrot.slane %v695_v14, %v884_v15  ;;  %v262_v21 = vrot.slane %v248_v16, %v884_v15 }
   0x9   :  { %v478_v11 = vrot.slane %v898_v34, %v884_v15  ;;  %v501_v14 = vrot.slane %v903_v35, %v884_v15 }
   0xa   :  { %725 = vmatmul.mubr.msk.bf16.vlgmr.msra.gmra.mrb[0].mxu0 %vm57_vm1, %v688_v5  ;;  %v227_v22 = vrot.slane %v216_v18, %v226_v17  ;;  %v231_v23 = vrot.slane %v223_v19, %v226_v17  ;;  %v266_v24 = vrot.slane %v255_v20, %v226_v17  ;;  %v270_v25 = vrot.slane %v262_v21, %v226_v17 }
   0xb   :  { %736 = vmatprep.mubr.msk.bf16.mxu0 %vm792_vm0, %v791_v0  ;;  %v479_v12 = vcombine.high %v478_v11, %v478_v11  ;;  %v486_v13 = vrot.slane %v478_v11, %v884_v15  ;;  %v502_v18 = vcombine.high %v501_v14, %v501_v14  ;;  %v509_v19 = vrot.slane %v501_v14, %v884_v15 }
   0xc   :  { %233 = vperm.xlu0 %771, %v227_v22   ;;  %236 = vperm.xlu1 %772, %v231_v23  }
   0xd   :  { %v493_v16 = vrot.slane %v479_v12, %v884_v15  ;;  %v494_v17 = vcombine.high %v486_v13, %v486_v13  ;;  %v516_v20 = vrot.slane %v502_v18, %v884_v15  ;;  %v517_v21 = vcombine.high %v509_v19, %v509_v19 }
   0xf   :  { %v520_v22 = vcombine.low %v486_v13, %v493_v16  ;;  %v521_v23 = vcombine.low %v494_v17, %v509_v19 }
  0x10   :  { %272 = vperm.xlu0 %771, %v266_v24   ;;  %275 = vperm.xlu1 %772, %v270_v25   ;;  %v522_v24 = vcombine.low %v516_v20, %v517_v21 }
  0x11   :  { %v529_v25 = vrot.slane %v520_v22, %v884_v15 }
  0x8b   :  { %v234_v36 = vpop.permute.xlu0 %233  ;;  %v237_v37 = vpop.permute.xlu1 %236 }
  0x8c   :  { %vm238_vm3 = vcmp.lt.s32.totalorder %v875_v9, %v234_v36  ;;  %vm239_vm5 = vcmp.lt.s32.totalorder %v875_v9, %v237_v37 }
  0x8f   :  { %v273_v39 = vpop.permute.xlu0 %272  ;;  %v276_v40 = vpop.permute.xlu1 %275 }
  0x90   :  { %vm277_vm4 = vcmp.lt.s32.totalorder %v200_v38, %v273_v39  ;;  %vm278_vm6 = vcmp.lt.s32.totalorder %v200_v38, %v276_v40 }
  0x91   :  { %vm279_vm8 = vmand %vm238_vm3, %vm277_vm4 }
  0x92   :  { %vm280_vm9 = vmand %vm239_vm5, %vm278_vm6 }
  0xdd   :  { %v95_v26 = vpop.f32.mrb[0].mxu0 }
  0xde   :  { %v102_v27 = vpack.c.bf16 %v95_v26, %v95_v26  ;;  %v726_v28 = vpop.f32.mrb[1].mxu0  ;;  %v536_v26 = vrot.slane %v521_v23, %v884_v15 }
  0xdf   :  { %v98_v29 = vpop.f32.mrb[2].mxu0 }
  0xe0   :  { %v103_v30 = vpack.c.bf16 %v98_v29, %v98_v29  ;;  %v727_v31 = vpop.f32.mrb[3].mxu0  ;;  %v109_v32 = vsel %vm104_vm2, %v102_v27, 0  ;;  %v543_v27 = vrot.slane %v522_v24, %v884_v15  ;;  %v544_v28 = vcombine.low %v529_v25, %v536_v26  ;;  %v777_v29 = vld [vmem:[%s977_s5] sm:$0xff]  }
  0xe1   :  { %729 = vmatpush3.bf16.xpose.msra.mxu1 %v109_v32 }
  0xe2   :  { %v155_v33 = vsel %vm104_vm2, %v103_v30, 0  ;;  %740 = vmatprep.subr.bf16.mxu1 %v791_v0  ;;  %v776_v30 = vld [vmem:[%s978_s6] sm:$0xff]   ;;  %v551_v31 = vrot.slane %v544_v28, %v884_v15  ;;  %v558_v32 = vrot.slane %v543_v27, %v884_v15 }
  0xe3   :  { %735 = vmatpush3.bf16.xpose.msra.mxu0 %v155_v33  ;;  %v778_v33 = vld [vmem:[%s977_s5 + $0x8] sm:$0xff]  }
  0xe4   :  { %746 = vmatprep.subr.bf16.mxu0 %v791_v0 }
  0xe8   :  { %731 = vmatmul.mubr.msk.bf16.vlgmr.msra.gmra.mrb[0].mxu1 %vm104_vm2, %v898_v34  ;;  %v559_v34 = vcombine.low %v551_v31, %v558_v32 }
  0xe9   :  { %742 = vmatprep.mubr.msk.bf16.mxu1 %vm792_vm0, %v791_v0  ;;  %741 = vmatpush3.bf16.msra.mxu1 %v316_v63 }
  0xea   :  { %737 = vmatmul.mubr.msk.bf16.vlgmr.msra.gmra.mrb[4].mxu0 %vm104_vm2, %v903_v35  ;;  %752 = vmatprep.subr.bf16.mxu1 %v791_v0  ;;  %v795_v35 = vmov 1983009808  }
  0xeb   :  { %748 = vmatprep.mubr.msk.bf16.mxu0 %vm792_vm0, %v791_v0  ;;  %747 = vmatpush3.bf16.msra.mxu0 %v362_v1  ;;  %v408_v36 = vunpack.c.l.s4 %v795_v35 }
  0xec   :  { %758 = vmatprep.subr.bf16.mxu0 %v791_v0 }
  0xed   :  { %v409_v37 = vunpack.c.0.s8 %v408_v36 }
  0xef   :  { %v412_v38 = vsub.s32 %v409_v37, %v875_v9 }
 0x1bb   :  { %v145_v41 = vpop.f32.mrb[0].mxu1 }
 0x1bc   :  { %v281_v42 = vsel %vm279_vm8, %v145_v41, -1000000.0  ;;  %v732_v43 = vpop.f32.mrb[1].mxu1 }
 0x1bd   :  { %v148_v44 = vpop.f32.mrb[2].mxu1  ;;  %v191_v45 = vpop.f32.mrb[4].mxu0  ;;  %v284_v46 = vsel %vm283_vm7, %v281_v42, -inf }
 0x1be   :  { %v282_v47 = vsel %vm280_vm9, %v191_v45, -1000000.0  ;;  %v738_v48 = vpop.f32.mrb[5].mxu0  ;;  %285 = vmax.xlane.f32.xlu0 %v284_v46  ;;  %v733_v49 = vpop.f32.mrb[3].mxu1 }
 0x1bf   :  { %v194_v50 = vpop.f32.mrb[6].mxu0  ;;  %v287_v51 = vsel %vm283_vm7, %v282_v47, -inf }
 0x1c0   :  { %288 = vmax.xlane.f32.xlu1 %v287_v51  ;;  %v739_v52 = vpop.f32.mrb[7].mxu0 }
 0x24b   :  { %v286_v53 = vpop.xlane.xlu0 %285 }
 0x24c   :  { %v290_v54 = vsub.f32 %v281_v42, %v286_v53 }
 0x24d   :  { %v289_v55 = vpop.xlane.xlu1 %288 }
 0x24e   :  { %v292_v56 = vmul.f32 1.442695, %v290_v54  ;;  %v291_v57 = vsub.f32 %v282_v47, %v289_v55 }
 0x250   :  { %779 = vpow2.f32 %v292_v56  ;;  %v294_v58 = vmul.f32 1.442695, %v291_v57 }
 0x252   :  { %781 = vpow2.f32 %v294_v58 }
 0x25a   :  { %v780_v59 = vpop.eup %779 }
 0x25b   :  { %v296_v60 = vsel %vm283_vm7, %v780_v59, 0.0 }
 0x25c   :  { %v782_v61 = vpop.eup %781  ;;  %297 = vadd.xlane.f32.xlu0 %v296_v60 }
 0x25d   :  { %v299_v62 = vsel %vm283_vm7, %v782_v61, 0.0 }
 0x260   :  { %300 = vadd.xlane.f32.xlu0 %v299_v62 }
 0x2e9   :  { %v298_v2 = vpop.xlane.xlu0 %297 }
 0x2ea   :  { %783 = vrcp.f32 %v298_v2  ;;  %v703_v2 = vld [vmem:[%s979_s7] ss:$0 sm:$0xff] }
 0x2ed   :  { %v301_v5 = vpop.xlane.xlu0 %300 }
 0x2ee   :  { %785 = vrcp.f32 %v301_v5 }
 0x2f4   :  { %v784_v6 = vpop.eup %783 }
 0x2f5   :  { %v303_v7 = vmul.f32 %v784_v6, %v780_v59 }
 0x2f7   :  { %306 = vst.msk [vmem:[%s976_s9] sm:$0x3f] %vm283_vm7, %v303_v7  ;;  %v308_v3 = vpack.c.bf16 %v303_v7, %v303_v7 }
 0x2f8   :  { %v786_v8 = vpop.eup %785 }
 0x2f9   :  { %v305_v10 = vmul.f32 %v786_v8, %v782_v61  ;;  %743 = vmatmul.mubr.msk.bf16.vlgmr.msra.gmra.mrb[4].mxu1 %vm310_vm11, %v308_v3 }
 0x2fa   :  { %754 = vmatprep.mubr.msk.bf16.mxu1 %vm792_vm0, %v791_v0  ;;  %753 = vmatpush3.bf16.msra.mxu1 %v776_v30 }
 0x2fb   :  { %307 = vst.msk [vmem:[%s976_s9 + $0x8] sm:$0x3f] %vm283_vm7, %v305_v10  ;;  %v309_v4 = vpack.c.bf16 %v305_v10, %v305_v10 }
 0x2fd   :  { %749 = vmatmul.mubr.msk.bf16.vlgmr.msra.gmra.mrb[8].mxu0 %vm310_vm11, %v309_v4 }
 0x2fe   :  { %762 = vmatprep.mubr.msk.bf16.mxu0 %vm792_vm0, %v791_v0  ;;  %759 = vmatpush3.bf16.msra.mxu0 %v777_v29 }
 0x2ff   :  { %760 = vmatprep.subr.bf16.mxu0 %v791_v0 }
 0x301   :  { %755 = vmatmul.mubr.msk.bf16.vlgmr.msra.gmra.mrb[8].mxu1 %vm104_vm2, %v559_v34 }
 0x302   :  { %761 = vmatpush3.bf16.msra.mxu0 %v778_v33 }
 0x3cc   :  { %v352_v39 = vpop.f32.mrb[4].mxu1 }
 0x3cd   :  { %v406_v40 = vcombine.high %v352_v39, %v352_v39  ;;  %v413_v41 = vrot.slane %v352_v39, %v412_v38  ;;  %v744_v15 = vpop.f32.mrb[5].mxu1 }
 0x3ce   :  { %v355_v42 = vpop.f32.mrb[6].mxu1 }
 0x3cf   :  { %v421_v43 = vcombine.high %v413_v41, %v413_v41  ;;  %v745_v0 = vpop.f32.mrb[7].mxu1  ;;  %v420_v45 = vrot.slane %v406_v40, %v412_v38 }
 0x3d0   :  { %v398_v44 = vpop.f32.mrb[8].mxu0 }
 0x3d1   :  { %v438_v46 = vcombine.low %v413_v41, %v421_v43  ;;  %v422_v47 = vcombine.high %v398_v44, %v398_v44  ;;  %v429_v48 = vrot.slane %v398_v44, %v412_v38  ;;  %v750_v49 = vpop.f32.mrb[9].mxu0 }
 0x3d2   :  { %v401_v50 = vpop.f32.mrb[10].mxu0 }
 0x3d3   :  { %v436_v51 = vrot.slane %v422_v47, %v412_v38  ;;  %v437_v52 = vcombine.high %v429_v48, %v429_v48  ;;  %v439_v53 = vcombine.low %v420_v45, %v429_v48  ;;  %v751_v54 = vpop.f32.mrb[11].mxu0  ;;  %v446_v55 = vrot.slane %v438_v46, %v412_v38 }
 0x3d4   :  { %v603_v60 = vpop.f32.mrb[8].mxu1 }
 0x3d5   :  { %v453_v9 = vrot.slane %v439_v53, %v412_v38  ;;  %v455_v56 = vcombine.low %v437_v52, %v436_v51  ;;  %v756_v61 = vpop.f32.mrb[9].mxu1 }
 0x3d6   :  { %v606_v62 = vpop.f32.mrb[10].mxu1 }
 0x3d7   :  { %v454_v57 = vcombine.low %v446_v55, %v453_v9  ;;  %v462_v58 = vrot.slane %v455_v56, %v412_v38  ;;  %v757_v63 = vpop.f32.mrb[11].mxu1 }
 0x3d9   :  { %v465_v59 = vpack.c.bf16 %v462_v58, %v454_v57 }
 0x3db   :  { %763 = vmatmul.mubr.msk.bf16.vlgmr.msra.gmra.mrb[12].mxu0 %vm57_vm1, %v465_v59 }
 0x4ae   :  { %v659_v1 = vpop.f32.mrb[12].mxu0 }
 0x4af   :  { %v660_v5 = vadd.f32 %v659_v1, %v603_v60  ;;  %v764_v6 = vpop.f32.mrb[13].mxu0 }
 0x4b0   :  { %v662_v7 = vpop.f32.mrb[14].mxu0 }
 0x4b1   :  { %v673_v3 = vadd.f32 %v703_v2, %v660_v5  ;;  %v663_v8 = vadd.f32 %v662_v7, %v606_v62  ;;  %v765_v10 = vpop.f32.mrb[15].mxu0 }
 0x4b3   :  { %787 = vtanh.f32 %v673_v3  ;;  %v674_v4 = vadd.f32 %v703_v2, %v663_v8 }
 0x4b5   :  { %789 = vtanh.f32 %v674_v4 }
 0x4bd   :  { %v788_v11 = vpop.eup %787 }
 0x4be   :  { %677 = vst.msk [vmem:[%s980_s8] sm:$0xff] %vm104_vm2, %v788_v11 }
 0x4bf   :  { %v790_v12 = vpop.eup %789 }
 0x4c0   :  { %679 = vst.msk [vmem:[%s980_s8 + $0x8] sm:$0xf] %vm678_vm12, %v790_v12 }

</bundles_post_ra>
